<compile_context>
chip_gen: v7x
topology: tpu7x:2x2x1
jax: 0.10.0
libtpu: 0.0.40
codegen_flags: <defaults>
</compile_context>

<pallas_src>
import functools

import jax
import jax.numpy as jnp
from jax import lax
from jax.experimental import pallas as pl
from jax.experimental.pallas import tpu as pltpu


# ----------------------------- Pallas kernel -------------------------------

def _rrcnn_kernel(x_ref, w11_ref, b11_ref,
                  wa_ref, sa_ref, ta_ref,
                  wb_ref, sb_ref, tb_ref,
                  o_ref, *, H):
    """Single grid step; whole batch folded into the matmul M dimension.

    x_ref  : (M, W*Cin)         bf16  input rows, M = N*H
    w11_ref: (W*Cin, W*Cout)    bf16  block-diagonal 1x1-conv weight
    b11_ref: (1, W*Cout)        f32   1x1-conv bias (tiled over W)
    w*_ref : (3*W*Cout, W*Cout) bf16  dy-fused width-banded 3x3 weight (K=3*W*C)
    s*_ref : (1, W*Cout)        f32   folded BN scale (tiled over W)
    t*_ref : (1, W*Cout)        f32   folded BN shift + conv bias (tiled over W)
    o_ref  : (M, W*Cout)        f32   output rows
    """
    M, WCo = o_ref.shape

    # Border masks for the folded batch: rows with (m % H) == 0 / H-1 are the
    # top/bottom rows of their image and must see zero padding for dy = -1/+1.
    row = lax.broadcasted_iota(jnp.int32, (M, WCo), 0)
    rh = row % H
    top = rh == 0
    bot = rh == H - 1

    # Hoist BN scale/shift loads and their (1,WCo)->(M,WCo) broadcasts out of
    # the 6 conv calls (JAX does not CSE broadcast_in_dim).
    sa = jnp.broadcast_to(sa_ref[...], (M, WCo))
    ta = jnp.broadcast_to(ta_ref[...], (M, WCo))
    sb = jnp.broadcast_to(sb_ref[...], (M, WCo))
    tb = jnp.broadcast_to(tb_ref[...], (M, WCo))

    def conv_bn_relu(inp, w_ref, s, t):
        # inp: (M, WCo) f32.  Zero-padded row shifts via non-negative XLU rolls
        # + border masks (f32 rolls/selects keep v5e happy); dy fused into K so
        # the 3x3 conv is a single MXU dot with exactly one f32->bf16 cast.
        up = jnp.where(top, 0.0, pltpu.roll(inp, 1, 0))       # row m holds inp[m-1]
        dn = jnp.where(bot, 0.0, pltpu.roll(inp, M - 1, 0))   # row m holds inp[m+1]
        lhs = jnp.concatenate([up, inp, dn], axis=-1).astype(jnp.bfloat16)
        acc = jnp.dot(lhs, w_ref[...], preferred_element_type=jnp.float32)
        # eval-mode BN with conv bias folded into the shift, then ReLU
        return jnp.maximum(acc * s + t, 0.0)

    def recurrent_block(inp, w_ref, s, t):
        # matches: for i in range(2): (i==0: x1 = conv(x)); x1 = conv(x + x1)
        x1 = conv_bn_relu(inp, w_ref, s, t)
        x1 = conv_bn_relu(inp + x1, w_ref, s, t)
        x1 = conv_bn_relu(inp + x1, w_ref, s, t)
        return x1

    x0 = jnp.dot(x_ref[...], w11_ref[...],
                 preferred_element_type=jnp.float32) + b11_ref[...]

    r = recurrent_block(x0, wa_ref, sa, ta)
    r = recurrent_block(r, wb_ref, sb, tb)
    o_ref[...] = (x0 + r).astype(o_ref.dtype)


# --------------------------- weight preprocessing ---------------------------

def _band_3x3(w, W):
    """(3, 3, Ci, Co) HWIO -> (3, W*Ci, W*Co) width-banded weights (one per dy).

    band[dy, win*Ci+ci, wout*Co+co] = w[dy, win-wout+1, ci, co]  if |win-wout|<=1,
    which implements SAME (padding=1) zero padding along W inside the matmul.
    """
    Kh, Kw, Ci, Co = w.shape
    win = jnp.arange(W)[:, None]
    wout = jnp.arange(W)[None, :]
    dx = win - wout + 1                                   # (W, W)
    valid = (dx >= 0) & (dx < Kw)
    dxc = jnp.clip(dx, 0, Kw - 1)
    blocks = w[:, dxc]                                    # (3, W, W, Ci, Co)
    blocks = jnp.where(valid[None, :, :, None, None], blocks, 0.0)
    band = jnp.transpose(blocks, (0, 1, 3, 2, 4))         # (3, W, Ci, W, Co)
    return band.reshape(Kh, W * Ci, W * Co)


def _band_1x1(w11, W):
    """(Ci, Co) -> (W*Ci, W*Co) block-diagonal 1x1-conv weight."""
    Ci, Co = w11.shape
    eye = jnp.eye(W, dtype=w11.dtype)
    band = jnp.einsum("uv,io->uivo", eye, w11)            # (W, Ci, W, Co)
    return band.reshape(W * Ci, W * Co)


# --------------------------------- wrapper ----------------------------------

@jax.jit
def rrcnn_block_pallas(x_nchw, params):
    N, Cin, H, W = x_nchw.shape
    Cout = params["w11"].shape[1]
    WCi, WCo = W * Cin, W * Cout
    M = N * H                                             # batch folded into M

    # NCHW -> lane-fused, batch-folded (N*H, W*Cin) bf16 rows (matmul-LHS only).
    x_rows = jnp.transpose(x_nchw, (0, 2, 3, 1)).reshape(M, WCi)
    x_rows = x_rows.astype(jnp.bfloat16)

    w11_b = _band_1x1(params["w11"], W).astype(jnp.bfloat16)
    b11_r = jnp.tile(params["b11"], (1, W)).astype(jnp.float32)

    def prep(w, b, s, t):
        wb = _band_3x3(w, W).reshape(3 * WCo, WCo).astype(jnp.bfloat16)  # dy fused into K
        s_r = jnp.tile(s, (1, W)).astype(jnp.float32)
        t_r = jnp.tile(b * s + t, (1, W)).astype(jnp.float32)            # fold conv bias
        return wb, s_r, t_r

    wa_b, sa_r, ta_r = prep(params["w_a"], params["b_a"], params["s_a"], params["t_a"])
    wb_b, sb_r, tb_r = prep(params["w_b"], params["b_b"], params["s_b"], params["t_b"])

    def _full(shape):
        return pl.BlockSpec(shape, lambda n, _s=shape: (0,) * len(_s))

    out_rows = pl.pallas_call(
        functools.partial(_rrcnn_kernel, H=H),
        out_shape=jax.ShapeDtypeStruct((M, WCo), jnp.float32),
        grid_spec=pltpu.PrefetchScalarGridSpec(
            num_scalar_prefetch=0,
            grid=(1,),
            in_specs=[
                _full((M, WCi)),
                _full((WCi, WCo)), _full((1, WCo)),
                _full((3 * WCo, WCo)), _full((1, WCo)), _full((1, WCo)),
                _full((3 * WCo, WCo)), _full((1, WCo)), _full((1, WCo)),
            ],
            out_specs=_full((M, WCo)),
        ),
        compiler_params=pltpu.CompilerParams(
            dimension_semantics=("arbitrary",)),
    )(x_rows, w11_b, b11_r, wa_b, sa_r, ta_r, wb_b, sb_r, tb_r)

    out_nhwc = out_rows.reshape(N, H, W, Cout)
    return jnp.transpose(out_nhwc, (0, 3, 1, 2)).astype(x_nchw.dtype)


# --------------------------- pure-JAX reference -----------------------------

def rrcnn_block_ref(x_nchw, params):
    x = jnp.transpose(x_nchw, (0, 2, 3, 1)).astype(jnp.float32)

    def cbr(inp, w, b, s, t):
        y = lax.conv_general_dilated(
            inp.astype(jnp.bfloat16), w.astype(jnp.bfloat16),
            window_strides=(1, 1), padding="SAME",
            dimension_numbers=("NHWC", "HWIO", "NHWC"),
            preferred_element_type=jnp.float32)
        y = (y + b) * s + t
        return jnp.maximum(y, 0.0)

    def rb(inp, w, b, s, t):
        x1 = cbr(inp, w, b, s, t)
        x1 = cbr(inp + x1, w, b, s, t)
        x1 = cbr(inp + x1, w, b, s, t)
        return x1

    x0 = jnp.matmul(x.astype(jnp.bfloat16),
                    params["w11"].astype(jnp.bfloat16),
                    preferred_element_type=jnp.float32) + params["b11"]
    r = rb(x0, params["w_a"], params["b_a"], params["s_a"], params["t_a"])
    r = rb(r, params["w_b"], params["b_b"], params["s_b"], params["t_b"])
    out = x0 + r
    return jnp.transpose(out, (0, 3, 1, 2))


# --------------------------------- main --------------------------------------

def make_params(key, ch_in, ch_out):
    ks = jax.random.split(key, 16)
    eps = 1e-5

    def bn_fold(kg, kb, km, kv):
        gamma = 1.0 + 0.1 * jax.random.normal(kg, (1, ch_out), jnp.float32)
        beta = 0.1 * jax.random.normal(kb, (1, ch_out), jnp.float32)
        mean = 0.1 * jax.random.normal(km, (1, ch_out), jnp.float32)
        var = 1.0 + 0.1 * jnp.abs(jax.random.normal(kv, (1, ch_out), jnp.float32))
        scale = gamma * lax.rsqrt(var + eps)
        shift = beta - mean * scale
        return scale, shift

    s_a, t_a = bn_fold(ks[4], ks[5], ks[6], ks[7])
    s_b, t_b = bn_fold(ks[10], ks[11], ks[12], ks[13])
    return {
        "w11": 0.2 * jax.random.normal(ks[0], (ch_in, ch_out), jnp.float32),
        "b11": 0.1 * jax.random.normal(ks[1], (1, ch_out), jnp.float32),
        "w_a": 0.1 * jax.random.normal(ks[2], (3, 3, ch_out, ch_out), jnp.float32),
        "b_a": 0.1 * jax.random.normal(ks[3], (1, ch_out), jnp.float32),
        "s_a": s_a, "t_a": t_a,
        "w_b": 0.1 * jax.random.normal(ks[8], (3, 3, ch_out, ch_out), jnp.float32),
        "b_b": 0.1 * jax.random.normal(ks[9], (1, ch_out), jnp.float32),
        "s_b": s_b, "t_b": t_b,
    }


if __name__ == "__main__":
    N, CH_IN, CH_OUT, H, W = 2, 4, 8, 16, 16

    root = jax.random.PRNGKey(0)
    kx, kp = jax.random.split(root)
    x = jax.random.normal(kx, (N, CH_IN, H, W), jnp.float32)   # NCHW, like PyTorch
    params = make_params(kp, CH_IN, CH_OUT)

    out = jax.block_until_ready(rrcnn_block_pallas(x, params))
    ref = jax.block_until_ready(rrcnn_block_ref(x, params))

    assert out.shape == (N, CH_OUT, H, W), out.shape
    # tolerance reflects bf16 matmul operands (f32 accumulation) in both paths
    err = float(jnp.max(jnp.abs(out - ref)))
    assert jnp.allclose(out, ref, atol=3e-2, rtol=3e-2), err

    print("KERNEL_OK")
</pallas_src>

<mosaic_0001>
module attributes {stable_mosaic.version = 11 : i64} {
  func.func @_rrcnn_kernel(%arg0: i32, %arg1: memref<32x64xbf16, #tpu.memory_space<vmem>>, %arg2: memref<64x128xbf16, #tpu.memory_space<vmem>>, %arg3: memref<1x128xf32, #tpu.memory_space<vmem>>, %arg4: memref<384x128xbf16, #tpu.memory_space<vmem>>, %arg5: memref<1x128xf32, #tpu.memory_space<vmem>>, %arg6: memref<1x128xf32, #tpu.memory_space<vmem>>, %arg7: memref<384x128xbf16, #tpu.memory_space<vmem>>, %arg8: memref<1x128xf32, #tpu.memory_space<vmem>>, %arg9: memref<1x128xf32, #tpu.memory_space<vmem>>, %arg10: memref<32x128xf32, #tpu.memory_space<vmem>>) attributes {dimension_semantics = [#tpu.dimension_semantics<arbitrary>], iteration_bounds = array<i64: 1>, scalar_prefetch = 0 : i64, scratch_operands = 0 : i64, tpu.core_type = #tpu.core_type<tc>, window_params = [{pipeline_mode = #tpu.pipeline_mode<synchronous>, transform_indices = @transform_0, window_bounds = array<i64: 32, 64>}, {pipeline_mode = #tpu.pipeline_mode<synchronous>, transform_indices = @transform_1, window_bounds = array<i64: 64, 128>}, {pipeline_mode = #tpu.pipeline_mode<synchronous>, transform_indices = @transform_2, window_bounds = array<i64: 1, 128>}, {pipeline_mode = #tpu.pipeline_mode<synchronous>, transform_indices = @transform_3, window_bounds = array<i64: 384, 128>}, {pipeline_mode = #tpu.pipeline_mode<synchronous>, transform_indices = @transform_4, window_bounds = array<i64: 1, 128>}, {pipeline_mode = #tpu.pipeline_mode<synchronous>, transform_indices = @transform_5, window_bounds = array<i64: 1, 128>}, {pipeline_mode = #tpu.pipeline_mode<synchronous>, transform_indices = @transform_6, window_bounds = array<i64: 384, 128>}, {pipeline_mode = #tpu.pipeline_mode<synchronous>, transform_indices = @transform_7, window_bounds = array<i64: 1, 128>}, {pipeline_mode = #tpu.pipeline_mode<synchronous>, transform_indices = @transform_8, window_bounds = array<i64: 1, 128>}, {pipeline_mode = #tpu.pipeline_mode<synchronous>, transform_indices = @transform_9, window_bounds = array<i64: 32, 128>}]} {
    %0 = tpu.iota {dimensions = array<i32: 0>} : vector<32x128xi32>
    %c16_i32 = arith.constant 16 : i32
    %c0_i32 = arith.constant 0 : i32
    %1 = arith.cmpi eq, %c16_i32, %c0_i32 : i32
    %c1_i32 = arith.constant 1 : i32
    %2 = arith.select %1, %c1_i32, %c16_i32 : i32
    %3 = vector.broadcast %2 : i32 to vector<32x128xi32>
    %4 = arith.remsi %0, %3 : vector<32x128xi32>
    %c0_i32_0 = arith.constant 0 : i32
    %5 = vector.broadcast %c0_i32_0 : i32 to vector<32x128xi32>
    %6 = arith.cmpi ne, %4, %5 : vector<32x128xi32>
    %c0_i32_1 = arith.constant 0 : i32
    %7 = vector.broadcast %c0_i32_1 : i32 to vector<32x128xi32>
    %8 = arith.cmpi slt, %4, %7 : vector<32x128xi32>
    %c0_i32_2 = arith.constant 0 : i32
    %9 = arith.cmpi slt, %2, %c0_i32_2 : i32
    %10 = vector.broadcast %9 : i1 to vector<32x128xi1>
    %11 = vector.broadcast %10 : vector<32x128xi1> to vector<32x128xi1>
    %12 = arith.xori %8, %11 : vector<32x128xi1>
    %13 = arith.andi %12, %6 : vector<32x128xi1>
    %14 = vector.broadcast %2 : i32 to vector<32x128xi32>
    %15 = arith.addi %4, %14 : vector<32x128xi32>
    %16 = arith.select %13, %15, %4 : vector<32x128xi1>, vector<32x128xi32>
    %c0_i32_3 = arith.constant 0 : i32
    %17 = vector.broadcast %c0_i32_3 : i32 to vector<32x128xi32>
    %18 = arith.cmpi eq, %16, %17 : vector<32x128xi32>
    %c15_i32 = arith.constant 15 : i32
    %19 = vector.broadcast %c15_i32 : i32 to vector<32x128xi32>
    %20 = arith.cmpi eq, %16, %19 : vector<32x128xi32>
    %c0 = arith.constant 0 : index
    %c0_4 = arith.constant 0 : index
    %21 = vector.load %arg5[%c0, %c0_4] : memref<1x128xf32, #tpu.memory_space<vmem>>, vector<1x128xf32>
    %22 = vector.shape_cast %21 : vector<1x128xf32> to vector<1x128xf32>
    %23 = vector.broadcast %22 : vector<1x128xf32> to vector<32x128xf32>
    %c0_5 = arith.constant 0 : index
    %c0_6 = arith.constant 0 : index
    %24 = vector.load %arg6[%c0_5, %c0_6] : memref<1x128xf32, #tpu.memory_space<vmem>>, vector<1x128xf32>
    %25 = vector.shape_cast %24 : vector<1x128xf32> to vector<1x128xf32>
    %26 = vector.broadcast %25 : vector<1x128xf32> to vector<32x128xf32>
    %c0_7 = arith.constant 0 : index
    %c0_8 = arith.constant 0 : index
    %27 = vector.load %arg8[%c0_7, %c0_8] : memref<1x128xf32, #tpu.memory_space<vmem>>, vector<1x128xf32>
    %28 = vector.shape_cast %27 : vector<1x128xf32> to vector<1x128xf32>
    %29 = vector.broadcast %28 : vector<1x128xf32> to vector<32x128xf32>
    %c0_9 = arith.constant 0 : index
    %c0_10 = arith.constant 0 : index
    %30 = vector.load %arg9[%c0_9, %c0_10] : memref<1x128xf32, #tpu.memory_space<vmem>>, vector<1x128xf32>
    %31 = vector.shape_cast %30 : vector<1x128xf32> to vector<1x128xf32>
    %32 = vector.broadcast %31 : vector<1x128xf32> to vector<32x128xf32>
    %c0_11 = arith.constant 0 : index
    %c0_12 = arith.constant 0 : index
    %33 = vector.load %arg1[%c0_11, %c0_12] : memref<32x64xbf16, #tpu.memory_space<vmem>>, vector<32x64xbf16>
    %c0_13 = arith.constant 0 : index
    %c0_14 = arith.constant 0 : index
    %34 = vector.load %arg2[%c0_13, %c0_14] : memref<64x128xbf16, #tpu.memory_space<vmem>>, vector<64x128xbf16>
    %cst = arith.constant dense<0.000000e+00> : vector<32x128xf32>
    %35 = tpu.matmul %33, %34, %cst {dimension_numbers = #tpu.dot_dimension_numbers<[1], [0], [0], [1], [0, 0, 1, 1], [], []>} : vector<32x64xbf16>, vector<64x128xbf16>, vector<32x128xf32> -> vector<32x128xf32>
    %c0_15 = arith.constant 0 : index
    %c0_16 = arith.constant 0 : index
    %36 = vector.load %arg3[%c0_15, %c0_16] : memref<1x128xf32, #tpu.memory_space<vmem>>, vector<1x128xf32>
    %37 = vector.broadcast %36 : vector<1x128xf32> to vector<32x128xf32>
    %38 = arith.addf %35, %37 : vector<32x128xf32>
    %c1_i32_17 = arith.constant 1 : i32
    %39 = tpu.dynamic_rotate %38 by %c1_i32_17 dim 0 : vector<32x128xf32>, i32 -> vector<32x128xf32>
    %cst_18 = arith.constant 0.000000e+00 : f32
    %40 = vector.broadcast %cst_18 : f32 to vector<32x128xf32>
    %41 = arith.select %18, %40, %39 : vector<32x128xi1>, vector<32x128xf32>
    %c31_i32 = arith.constant 31 : i32
    %42 = tpu.dynamic_rotate %38 by %c31_i32 dim 0 : vector<32x128xf32>, i32 -> vector<32x128xf32>
    %cst_19 = arith.constant 0.000000e+00 : f32
    %43 = vector.broadcast %cst_19 : f32 to vector<32x128xf32>
    %44 = arith.select %20, %43, %42 : vector<32x128xi1>, vector<32x128xf32>
    %45 = tpu.concatenate %41, %38, %44 in 1 : vector<32x128xf32>, vector<32x128xf32>, vector<32x128xf32> -> vector<32x384xf32>
    %46 = arith.truncf %45 : vector<32x384xf32> to vector<32x384xbf16>
    %c0_20 = arith.constant 0 : index
    %c0_21 = arith.constant 0 : index
    %47 = vector.load %arg4[%c0_20, %c0_21] : memref<384x128xbf16, #tpu.memory_space<vmem>>, vector<384x128xbf16>
    %cst_22 = arith.constant dense<0.000000e+00> : vector<32x128xf32>
    %48 = tpu.matmul %46, %47, %cst_22 {dimension_numbers = #tpu.dot_dimension_numbers<[1], [0], [0], [1], [0, 0, 1, 1], [], []>} : vector<32x384xbf16>, vector<384x128xbf16>, vector<32x128xf32> -> vector<32x128xf32>
    %49 = arith.mulf %48, %23 : vector<32x128xf32>
    %50 = arith.addf %49, %26 : vector<32x128xf32>
    %cst_23 = arith.constant 0.000000e+00 : f32
    %51 = vector.broadcast %cst_23 : f32 to vector<32x128xf32>
    %52 = arith.maximumf %50, %51 : vector<32x128xf32>
    %53 = arith.addf %38, %52 : vector<32x128xf32>
    %c1_i32_24 = arith.constant 1 : i32
    %54 = tpu.dynamic_rotate %53 by %c1_i32_24 dim 0 : vector<32x128xf32>, i32 -> vector<32x128xf32>
    %cst_25 = arith.constant 0.000000e+00 : f32
    %55 = vector.broadcast %cst_25 : f32 to vector<32x128xf32>
    %56 = arith.select %18, %55, %54 : vector<32x128xi1>, vector<32x128xf32>
    %c31_i32_26 = arith.constant 31 : i32
    %57 = tpu.dynamic_rotate %53 by %c31_i32_26 dim 0 : vector<32x128xf32>, i32 -> vector<32x128xf32>
    %cst_27 = arith.constant 0.000000e+00 : f32
    %58 = vector.broadcast %cst_27 : f32 to vector<32x128xf32>
    %59 = arith.select %20, %58, %57 : vector<32x128xi1>, vector<32x128xf32>
    %60 = tpu.concatenate %56, %53, %59 in 1 : vector<32x128xf32>, vector<32x128xf32>, vector<32x128xf32> -> vector<32x384xf32>
    %61 = arith.truncf %60 : vector<32x384xf32> to vector<32x384xbf16>
    %c0_28 = arith.constant 0 : index
    %c0_29 = arith.constant 0 : index
    %62 = vector.load %arg4[%c0_28, %c0_29] : memref<384x128xbf16, #tpu.memory_space<vmem>>, vector<384x128xbf16>
    %cst_30 = arith.constant dense<0.000000e+00> : vector<32x128xf32>
    %63 = tpu.matmul %61, %62, %cst_30 {dimension_numbers = #tpu.dot_dimension_numbers<[1], [0], [0], [1], [0, 0, 1, 1], [], []>} : vector<32x384xbf16>, vector<384x128xbf16>, vector<32x128xf32> -> vector<32x128xf32>
    %64 = arith.mulf %63, %23 : vector<32x128xf32>
    %65 = arith.addf %64, %26 : vector<32x128xf32>
    %cst_31 = arith.constant 0.000000e+00 : f32
    %66 = vector.broadcast %cst_31 : f32 to vector<32x128xf32>
    %67 = arith.maximumf %65, %66 : vector<32x128xf32>
    %68 = arith.addf %38, %67 : vector<32x128xf32>
    %c1_i32_32 = arith.constant 1 : i32
    %69 = tpu.dynamic_rotate %68 by %c1_i32_32 dim 0 : vector<32x128xf32>, i32 -> vector<32x128xf32>
    %cst_33 = arith.constant 0.000000e+00 : f32
    %70 = vector.broadcast %cst_33 : f32 to vector<32x128xf32>
    %71 = arith.select %18, %70, %69 : vector<32x128xi1>, vector<32x128xf32>
    %c31_i32_34 = arith.constant 31 : i32
    %72 = tpu.dynamic_rotate %68 by %c31_i32_34 dim 0 : vector<32x128xf32>, i32 -> vector<32x128xf32>
    %cst_35 = arith.constant 0.000000e+00 : f32
    %73 = vector.broadcast %cst_35 : f32 to vector<32x128xf32>
    %74 = arith.select %20, %73, %72 : vector<32x128xi1>, vector<32x128xf32>
    %75 = tpu.concatenate %71, %68, %74 in 1 : vector<32x128xf32>, vector<32x128xf32>, vector<32x128xf32> -> vector<32x384xf32>
    %76 = arith.truncf %75 : vector<32x384xf32> to vector<32x384xbf16>
    %c0_36 = arith.constant 0 : index
    %c0_37 = arith.constant 0 : index
    %77 = vector.load %arg4[%c0_36, %c0_37] : memref<384x128xbf16, #tpu.memory_space<vmem>>, vector<384x128xbf16>
    %cst_38 = arith.constant dense<0.000000e+00> : vector<32x128xf32>
    %78 = tpu.matmul %76, %77, %cst_38 {dimension_numbers = #tpu.dot_dimension_numbers<[1], [0], [0], [1], [0, 0, 1, 1], [], []>} : vector<32x384xbf16>, vector<384x128xbf16>, vector<32x128xf32> -> vector<32x128xf32>
    %79 = arith.mulf %78, %23 : vector<32x128xf32>
    %80 = arith.addf %79, %26 : vector<32x128xf32>
    %cst_39 = arith.constant 0.000000e+00 : f32
    %81 = vector.broadcast %cst_39 : f32 to vector<32x128xf32>
    %82 = arith.maximumf %80, %81 : vector<32x128xf32>
    %c1_i32_40 = arith.constant 1 : i32
    %83 = tpu.dynamic_rotate %82 by %c1_i32_40 dim 0 : vector<32x128xf32>, i32 -> vector<32x128xf32>
    %cst_41 = arith.constant 0.000000e+00 : f32
    %84 = vector.broadcast %cst_41 : f32 to vector<32x128xf32>
    %85 = arith.select %18, %84, %83 : vector<32x128xi1>, vector<32x128xf32>
    %c31_i32_42 = arith.constant 31 : i32
    %86 = tpu.dynamic_rotate %82 by %c31_i32_42 dim 0 : vector<32x128xf32>, i32 -> vector<32x128xf32>
    %cst_43 = arith.constant 0.000000e+00 : f32
    %87 = vector.broadcast %cst_43 : f32 to vector<32x128xf32>
    %88 = arith.select %20, %87, %86 : vector<32x128xi1>, vector<32x128xf32>
    %89 = tpu.concatenate %85, %82, %88 in 1 : vector<32x128xf32>, vector<32x128xf32>, vector<32x128xf32> -> vector<32x384xf32>
    %90 = arith.truncf %89 : vector<32x384xf32> to vector<32x384xbf16>
    %c0_44 = arith.constant 0 : index
    %c0_45 = arith.constant 0 : index
    %91 = vector.load %arg7[%c0_44, %c0_45] : memref<384x128xbf16, #tpu.memory_space<vmem>>, vector<384x128xbf16>
    %cst_46 = arith.constant dense<0.000000e+00> : vector<32x128xf32>
    %92 = tpu.matmul %90, %91, %cst_46 {dimension_numbers = #tpu.dot_dimension_numbers<[1], [0], [0], [1], [0, 0, 1, 1], [], []>} : vector<32x384xbf16>, vector<384x128xbf16>, vector<32x128xf32> -> vector<32x128xf32>
    %93 = arith.mulf %92, %29 : vector<32x128xf32>
    %94 = arith.addf %93, %32 : vector<32x128xf32>
    %cst_47 = arith.constant 0.000000e+00 : f32
    %95 = vector.broadcast %cst_47 : f32 to vector<32x128xf32>
    %96 = arith.maximumf %94, %95 : vector<32x128xf32>
    %97 = arith.addf %82, %96 : vector<32x128xf32>
    %c1_i32_48 = arith.constant 1 : i32
    %98 = tpu.dynamic_rotate %97 by %c1_i32_48 dim 0 : vector<32x128xf32>, i32 -> vector<32x128xf32>
    %cst_49 = arith.constant 0.000000e+00 : f32
    %99 = vector.broadcast %cst_49 : f32 to vector<32x128xf32>
    %100 = arith.select %18, %99, %98 : vector<32x128xi1>, vector<32x128xf32>
    %c31_i32_50 = arith.constant 31 : i32
    %101 = tpu.dynamic_rotate %97 by %c31_i32_50 dim 0 : vector<32x128xf32>, i32 -> vector<32x128xf32>
    %cst_51 = arith.constant 0.000000e+00 : f32
    %102 = vector.broadcast %cst_51 : f32 to vector<32x128xf32>
    %103 = arith.select %20, %102, %101 : vector<32x128xi1>, vector<32x128xf32>
    %104 = tpu.concatenate %100, %97, %103 in 1 : vector<32x128xf32>, vector<32x128xf32>, vector<32x128xf32> -> vector<32x384xf32>
    %105 = arith.truncf %104 : vector<32x384xf32> to vector<32x384xbf16>
    %c0_52 = arith.constant 0 : index
    %c0_53 = arith.constant 0 : index
    %106 = vector.load %arg7[%c0_52, %c0_53] : memref<384x128xbf16, #tpu.memory_space<vmem>>, vector<384x128xbf16>
    %cst_54 = arith.constant dense<0.000000e+00> : vector<32x128xf32>
    %107 = tpu.matmul %105, %106, %cst_54 {dimension_numbers = #tpu.dot_dimension_numbers<[1], [0], [0], [1], [0, 0, 1, 1], [], []>} : vector<32x384xbf16>, vector<384x128xbf16>, vector<32x128xf32> -> vector<32x128xf32>
    %108 = arith.mulf %107, %29 : vector<32x128xf32>
    %109 = arith.addf %108, %32 : vector<32x128xf32>
    %cst_55 = arith.constant 0.000000e+00 : f32
    %110 = vector.broadcast %cst_55 : f32 to vector<32x128xf32>
    %111 = arith.maximumf %109, %110 : vector<32x128xf32>
    %112 = arith.addf %82, %111 : vector<32x128xf32>
    %c1_i32_56 = arith.constant 1 : i32
    %113 = tpu.dynamic_rotate %112 by %c1_i32_56 dim 0 : vector<32x128xf32>, i32 -> vector<32x128xf32>
    %cst_57 = arith.constant 0.000000e+00 : f32
    %114 = vector.broadcast %cst_57 : f32 to vector<32x128xf32>
    %115 = arith.select %18, %114, %113 : vector<32x128xi1>, vector<32x128xf32>
    %c31_i32_58 = arith.constant 31 : i32
    %116 = tpu.dynamic_rotate %112 by %c31_i32_58 dim 0 : vector<32x128xf32>, i32 -> vector<32x128xf32>
    %cst_59 = arith.constant 0.000000e+00 : f32
    %117 = vector.broadcast %cst_59 : f32 to vector<32x128xf32>
    %118 = arith.select %20, %117, %116 : vector<32x128xi1>, vector<32x128xf32>
    %119 = tpu.concatenate %115, %112, %118 in 1 : vector<32x128xf32>, vector<32x128xf32>, vector<32x128xf32> -> vector<32x384xf32>
    %120 = arith.truncf %119 : vector<32x384xf32> to vector<32x384xbf16>
    %c0_60 = arith.constant 0 : index
    %c0_61 = arith.constant 0 : index
    %121 = vector.load %arg7[%c0_60, %c0_61] : memref<384x128xbf16, #tpu.memory_space<vmem>>, vector<384x128xbf16>
    %cst_62 = arith.constant dense<0.000000e+00> : vector<32x128xf32>
    %122 = tpu.matmul %120, %121, %cst_62 {dimension_numbers = #tpu.dot_dimension_numbers<[1], [0], [0], [1], [0, 0, 1, 1], [], []>} : vector<32x384xbf16>, vector<384x128xbf16>, vector<32x128xf32> -> vector<32x128xf32>
    %123 = arith.mulf %122, %29 : vector<32x128xf32>
    %124 = arith.addf %123, %32 : vector<32x128xf32>
    %cst_63 = arith.constant 0.000000e+00 : f32
    %125 = vector.broadcast %cst_63 : f32 to vector<32x128xf32>
    %126 = arith.maximumf %124, %125 : vector<32x128xf32>
    %127 = arith.addf %38, %126 : vector<32x128xf32>
    %c0_64 = arith.constant 0 : index
    %c0_65 = arith.constant 0 : index
    %128 = vector.load %arg10[%c0_64, %c0_65] : memref<32x128xf32, #tpu.memory_space<vmem>>, vector<32x128xf32>
    tpu.vector_store %arg10[%c0_64, %c0_65], %127 {strides = array<i32>} : memref<32x128xf32, #tpu.memory_space<vmem>>, vector<32x128xf32>,
    return
  }
  func.func @transform_0(%arg0: i32) -> (i32, i32) {
    %c0_i32 = arith.constant 0 : i32
    %c0_i32_0 = arith.constant 0 : i32
    %c0_i32_1 = arith.constant 0 : i32
    return %c0_i32, %c0_i32_0 : i32, i32
  }
  func.func @transform_1(%arg0: i32) -> (i32, i32) {
    %c0_i32 = arith.constant 0 : i32
    %c0_i32_0 = arith.constant 0 : i32
    %c0_i32_1 = arith.constant 0 : i32
    return %c0_i32, %c0_i32_0 : i32, i32
  }
  func.func @transform_2(%arg0: i32) -> (i32, i32) {
    %c0_i32 = arith.constant 0 : i32
    %c0_i32_0 = arith.constant 0 : i32
    %c0_i32_1 = arith.constant 0 : i32
    return %c0_i32, %c0_i32_0 : i32, i32
  }
  func.func @transform_3(%arg0: i32) -> (i32, i32) {
    %c0_i32 = arith.constant 0 : i32
    %c0_i32_0 = arith.constant 0 : i32
    %c0_i32_1 = arith.constant 0 : i32
    return %c0_i32, %c0_i32_0 : i32, i32
  }
  func.func @transform_4(%arg0: i32) -> (i32, i32) {
    %c0_i32 = arith.constant 0 : i32
    %c0_i32_0 = arith.constant 0 : i32
    %c0_i32_1 = arith.constant 0 : i32
    return %c0_i32, %c0_i32_0 : i32, i32
  }
  func.func @transform_5(%arg0: i32) -> (i32, i32) {
    %c0_i32 = arith.constant 0 : i32
    %c0_i32_0 = arith.constant 0 : i32
    %c0_i32_1 = arith.constant 0 : i32
    return %c0_i32, %c0_i32_0 : i32, i32
  }
  func.func @transform_6(%arg0: i32) -> (i32, i32) {
    %c0_i32 = arith.constant 0 : i32
    %c0_i32_0 = arith.constant 0 : i32
    %c0_i32_1 = arith.constant 0 : i32
    return %c0_i32, %c0_i32_0 : i32, i32
  }
  func.func @transform_7(%arg0: i32) -> (i32, i32) {
    %c0_i32 = arith.constant 0 : i32
    %c0_i32_0 = arith.constant 0 : i32
    %c0_i32_1 = arith.constant 0 : i32
    return %c0_i32, %c0_i32_0 : i32, i32
  }
  func.func @transform_8(%arg0: i32) -> (i32, i32) {
    %c0_i32 = arith.constant 0 : i32
    %c0_i32_0 = arith.constant 0 : i32
    %c0_i32_1 = arith.constant 0 : i32
    return %c0_i32, %c0_i32_0 : i32, i32
  }
  func.func @transform_9(%arg0: i32) -> (i32, i32) {
    %c0_i32 = arith.constant 0 : i32
    %c0_i32_0 = arith.constant 0 : i32
    %c0_i32_1 = arith.constant 0 : i32
    return %c0_i32, %c0_i32_0 : i32, i32
  }
}

</mosaic_0001>

<bundles_post_ra>
// kernel: rrcnn_block_pallas.1
= control target key start
LH: loop header
LB: loop body
LE: loop exit
PB: predicated region body
PF: predicated region fallthrough
CT: control target
= control target key end

     0   :  { %vm175_vm0 = vcmask 523264   ;;  %v33_v30 = vlaneseq  ;;  %vm2067_vm6 = vmmov 1   ;;  %s2897_s1 = inlined_call_operand.vmem [shape: bf16[64,128], index: 1, kind: input, shape index: {}]   ;;  %s2898_s0 = inlined_call_operand.vmem [shape: bf16[32,64], index: 0, kind: input, shape index: {}]   ;;  %s2899_s3 = inlined_call_operand.vmem [shape: bf16[384,128], index: 3, kind: input, shape index: {}]   ;;  %s2900_s2 = inlined_call_operand.vmem [shape: f32[1,128], index: 2, kind: input, shape index: {}]   ;;  %s2901_s4 = inlined_call_operand.vmem [shape: f32[1,128], index: 4, kind: input, shape index: {}]   ;;  %s2902_s5 = inlined_call_operand.vmem [shape: f32[1,128], index: 5, kind: input, shape index: {}]   ;;  %s2903_s6 = inlined_call_operand.vmem [shape: bf16[384,128], index: 6, kind: input, shape index: {}]   ;;  %s2904_s7 = inlined_call_operand.vmem [shape: f32[1,128], index: 7, kind: input, shape index: {}]   ;;  %s2905_s8 = inlined_call_operand.vmem [shape: f32[1,128], index: 8, kind: input, shape index: {}]   ;;  %s2906_s9 = inlined_call_operand.vmem [shape: f32[32,128], index: 9, kind: output, shape index: {}]  }
   0x1   :  { %v2013_v0 = vld [vmem:[%s2897_s1] sm:$0xff]   ;;  %v2014_v1 = vld [vmem:[%s2897_s1 + $0x8] sm:$0xff]   ;;  %v2015_v2 = vld [vmem:[%s2897_s1 + $0x10] sm:$0xff]  }
   0x2   :  { %1880 = vmatprep.subr.bf16.mxu0 %v2013_v0  ;;  %v2017_v3 = vld [vmem:[%s2898_s0] sm:$0xff]   ;;  %v2016_v6 = vld [vmem:[%s2897_s1 + $0x18] sm:$0xff]   ;;  %v2149_v7 = vld [vmem:[%s2899_s3 + $0x48] sm:$0xff]   ;;  %v2292_v31 = vshrl.u32 %v33_v30, 7 }
   0x3   :  { %1881 = vmatpush3.bf16.msra.mxu0 %v2013_v0  ;;  %1888 = vmatprep.mubr.msk.bf16.mxu0 %vm175_vm0, %v2017_v3  ;;  %v2134_v4 = vld [vmem:[%s2899_s3 + $0x40] sm:$0xff]   ;;  %v2154_v8 = vld [vmem:[%s2899_s3 + $0x8] sm:$0xff]   ;;  %v2165_v10 = vld [vmem:[%s2899_s3 + $0x50] sm:$0xff]  }
   0x4   :  { %1882 = vmatprep.subr.bf16.mxu0 %v2014_v1  ;;  %v2139_v5 = vld [vmem:[%s2899_s3] sm:$0xff]   ;;  %1652 = vmatprep.subr.bf16.mxu1 %v2134_v4  ;;  %v2171_v11 = vld [vmem:[%s2899_s3 + $0x10] sm:$0xff]   ;;  %v2018_v12 = vld [vmem:[%s2898_s0 + $0x8] sm:$0xff]   ;;  %v35_v32 = vadd.s32 8, %v2292_v31  ;;  %v37_v34 = vadd.s32 24, %v2292_v31  ;;  %v42_v35 = vand.u32 15, %v2292_v31 }
   0x5   :  { %1653 = vmatpush3.bf16.msra.mxu1 %v2139_v5  ;;  %v2159_v9 = vld [vmem:[%s2899_s3 + $0x80] sm:$0xff]   ;;  %v2180_v13 = vld [vmem:[%s2899_s3 + $0x58] sm:$0xff]   ;;  %v2186_v14 = vld [vmem:[%s2899_s3 + $0x88] sm:$0xff]   ;;  %vm235_vm1 = vcmp.lt.s32.totalorder %v2292_v31, 1  ;;  %vm248_vm2 = vcmp.lt.s32.totalorder %v2292_v31, 7  ;;  %v36_v53 = vadd.s32 16, %v2292_v31 }
   0x6   :  { %1654 = vmatprep.subr.bf16.mxu1 %v2149_v7  ;;  %v2192_v15 = vld [vmem:[%s2899_s3 + $0x18] sm:$0xff]   ;;  %v2199_v16 = vld [vmem:[%s2899_s3 + $0x60] sm:$0xff]   ;;  %v2205_v17 = vld [vmem:[%s2899_s3 + $0x90] sm:$0xff]   ;;  %v49_v37 = vand.u32 15, %v35_v32  ;;  %v63_v42 = vand.u32 15, %v37_v34  ;;  %vm2308_vm3 = vcmp.ne.s32.totalorder %v42_v35, 0 }
   0x7   :  { %1883 = vmatpush3.bf16.msra.mxu0 %v2014_v1  ;;  %v2211_v18 = vld [vmem:[%s2899_s3 + $0x20] sm:$0xff]   ;;  %v2217_v19 = vld [vmem:[%s2899_s3 + $0x68] sm:$0xff]   ;;  %v2222_v20 = vld [vmem:[%s2899_s3 + $0x98] sm:$0xff]  }
   0x8   :  { %1884 = vmatprep.subr.bf16.mxu0 %v2015_v2  ;;  %v2234_v21 = vld [vmem:[%s2899_s3 + $0xa0] sm:$0xff]   ;;  %v2242_v22 = vld [vmem:[%s2899_s3 + $0x28] sm:$0xff]   ;;  %v2255_v24 = vld [vmem:[%s2899_s3 + $0x70] sm:$0xff]   ;;  %vm2316_vm4 = vcmp.ne.s32.totalorder %v49_v37, 15  ;;  %vm1645_vm5 = vcmp.ne.s32.totalorder %v63_v42, 15 }
   0x9   :  { %1655 = vmatpush3.bf16.msra.mxu1 %v2154_v8  ;;  %v2247_v23 = vld [vmem:[%s2899_s3 + $0xa8] sm:$0xff]   ;;  %v2260_v25 = vld [vmem:[%s2899_s3 + $0x30] sm:$0xff]   ;;  %v2273_v27 = vld [vmem:[%s2899_s3 + $0x78] sm:$0xff]  }
   0xa   :  { %1656 = vmatprep.subr.bf16.mxu1 %v2165_v10  ;;  %v2265_v26 = vld [vmem:[%s2899_s3 + $0xb0] sm:$0xff]   ;;  %v2278_v28 = vld [vmem:[%s2899_s3 + $0x38] sm:$0xff]   ;;  %v1489_v33 = vld [vmem:[%s2900_s2] ss:$0 sm:$0xff] }
   0xb   :  { %1885 = vmatpush3.bf16.msra.mxu0 %v2015_v2  ;;  %v2285_v29 = vld [vmem:[%s2899_s3 + $0xb8] sm:$0xff]   ;;  %vm2333_vm7 = vmpackc.low %vm2067_vm6, %vm2308_vm3 }
   0xc   :  { %1886 = vmatprep.subr.bf16.mxu0 %v2016_v6  ;;  %vm2350_vm8 = vmpackc.low %vm2316_vm4, %vm2067_vm6 }
   0xd   :  { %1657 = vmatpush3.bf16.msra.mxu1 %v2171_v11  ;;  %vm2355_vm9 = vmpackc.low %vm1645_vm5, %vm2067_vm6 }
   0xe   :  { %1658 = vmatprep.subr.bf16.mxu1 %v2180_v13 }
   0xf   :  { %1887 = vmatpush3.bf16.msra.mxu0 %v2016_v6  ;;  %v56_v6 = vand.u32 15, %v36_v53 }
  0x10   :  { %1892 = vmatprep.subr.bf16.mxu0 %v2159_v9 }
  0x11   :  { %1659 = vmatpush3.bf16.msra.mxu1 %v2192_v15  ;;  %vm1643_vm10 = vcmp.ne.s32.totalorder %v56_v6, 0 }
  0x12   :  { %1889 = vmatmul.mubr.msk.bf16.vlgmr.msra.gmra.mrb[0].mxu0 %vm175_vm0, %v2018_v12  ;;  %1660 = vmatprep.subr.bf16.mxu1 %v2199_v16  ;;  %vm2377_vm11 = vmpackc.low %vm2067_vm6, %vm1643_vm10 }
  0x13   :  { %1893 = vmatpush3.bf16.msra.mxu0 %v2159_v9 }
  0x14   :  { %1894 = vmatprep.subr.bf16.mxu0 %v2186_v14 }
  0x15   :  { %1661 = vmatpush3.bf16.msra.mxu1 %v2211_v18 }
  0x16   :  { %1662 = vmatprep.subr.bf16.mxu1 %v2217_v19 }
  0x17   :  { %1895 = vmatpush3.bf16.msra.mxu0 %v2186_v14 }
  0x18   :  { %1896 = vmatprep.subr.bf16.mxu0 %v2205_v17 }
  0x19   :  { %1663 = vmatpush3.bf16.msra.mxu1 %v2242_v22 }
  0x1a   :  { %1664 = vmatprep.subr.bf16.mxu1 %v2255_v24 }
  0x1b   :  { %1897 = vmatpush3.bf16.msra.mxu0 %v2205_v17 }
  0x1c   :  { %1898 = vmatprep.subr.bf16.mxu0 %v2222_v20 }
  0x1d   :  { %1665 = vmatpush3.bf16.msra.mxu1 %v2260_v25 }
  0x1e   :  { %1666 = vmatprep.subr.bf16.mxu1 %v2273_v27 }
  0x1f   :  { %1899 = vmatpush3.bf16.msra.mxu0 %v2222_v20 }
  0x20   :  { %1900 = vmatprep.subr.bf16.mxu0 %v2234_v21 }
  0x21   :  { %1667 = vmatpush3.bf16.msra.mxu1 %v2278_v28 }
  0x22   :  { %1690 = vmatprep.subr.bf16.mxu1 %v2134_v4 }
  0x23   :  { %1901 = vmatpush3.bf16.msra.mxu0 %v2234_v21 }
  0x24   :  { %1902 = vmatprep.subr.bf16.mxu0 %v2247_v23 }
  0x27   :  { %1903 = vmatpush3.bf16.msra.mxu0 %v2247_v23 }
  0x28   :  { %1904 = vmatprep.subr.bf16.mxu0 %v2265_v26 }
  0x2b   :  { %1905 = vmatpush3.bf16.msra.mxu0 %v2265_v26 }
  0x2c   :  { %1906 = vmatprep.subr.bf16.mxu0 %v2285_v29 }
  0x2f   :  { %1907 = vmatpush3.bf16.msra.mxu0 %v2285_v29 }
  0x30   :  { %1912 = vmatprep.subr.bf16.mxu0 %v2159_v9 }
  0xe5   :  { %v1890_v36 = vpop.f32.mrb[0].mxu0 }
  0xe6   :  { %v2300_v38 = vadd.f32 %v1890_v36, %v1489_v33  ;;  %v216_v39 = vpop.f32.mrb[1].mxu0 }
  0xe7   :  { %v2302_v40 = vadd.f32 %v1489_v33, %v216_v39  ;;  %v1891_v41 = vpop.f32.mrb[2].mxu0 }
  0xe8   :  { %v2305_v43 = vadd.f32 %v1891_v41, %v1489_v33  ;;  %v219_v44 = vpop.f32.mrb[3].mxu0  ;;  %v246_v51 = vrot.slane %v2300_v38, 1  ;;  %v233_v32 = vrot.slane %v2300_v38, 7 }
  0xe9   :  { %v2312_v46 = vadd.f32 %v1489_v33, %v219_v44  ;;  %v231_v47 = vrot.slane %v2302_v40, 7  ;;  %v244_v48 = vrot.slane %v2302_v40, 1 }
  0xea   :  { %v234_v50 = vrot.slane %v2305_v43, 7  ;;  %v247_v52 = vrot.slane %v2305_v43, 1  ;;  %v261_v12 = vpack.c.bf16 %v2305_v43, %v2300_v38 }
  0xeb   :  { %v258_v54 = vpack.c.bf16 %v2312_v46, %v2302_v40  ;;  %v232_v55 = vrot.slane %v2312_v46, 7  ;;  %v245_v56 = vrot.slane %v2312_v46, 1 }
  0xec   :  { %v239_v57 = vsel %vm235_vm1, %v234_v50, %v231_v47  ;;  %v249_v59 = vsel %vm248_vm2, %v246_v51, %v247_v52  ;;  %v252_v60 = vsel %vm248_vm2, %v247_v52, %v244_v48  ;;  %v236_v33 = vsel %vm235_vm1, %v233_v32, %v234_v50 }
  0xed   :  { %487 = vmatprep.mubr.bf16.mxu1 %v258_v54  ;;  %v238_v61 = vsel %vm235_vm1, %v231_v47, %v232_v55  ;;  %v250_v62 = vsel %vm248_vm2, %v245_v56, %v246_v51  ;;  %v251_v63 = vsel %vm248_vm2, %v244_v48, %v245_v56  ;;  %v1536_v30 = vpack.c.bf16 %v252_v60, %v249_v59  ;;  %v2414_v47 = vld [vmem:[%s2901_s4] ss:$0 sm:$0xff] }
  0xee   :  { %v1524_v1 = vpack.c.bf16 %v238_v61, %v239_v57  ;;  %v1532_v2 = vpack.c.bf16 %v250_v62, %v251_v63  ;;  %v237_v34 = vsel %vm235_vm1, %v232_v55, %v233_v32 }
  0xef   :  { %v1528_v36 = vpack.c.bf16 %v236_v33, %v237_v34 }
  0xf0   :  { %1525 = vmatmul.mubr.msk.bf16.vlgmr.msra.gmra.mrb[0].mxu1 %vm2333_vm7, %v1524_v1  ;;  %1908 = vmatprep.mubr.msk.bf16.mxu0 %vm2350_vm8, %v1532_v2 }
  0xf1   :  { %495 = vmatprep.mubr.bf16.mxu1 %v261_v12  ;;  %1909 = vmatmul.mubr.msk.bf16.vlgmr.msra.gmra.mrb[4].mxu0 %vm2355_vm9, %v1536_v30 }
  0xf2   :  { %1691 = vmatpush3.bf16.msra.mxu1 %v2139_v5  ;;  %1913 = vmatpush3.bf16.msra.mxu0 %v2159_v9 }
  0xf3   :  { %1692 = vmatprep.subr.bf16.mxu1 %v2149_v7  ;;  %1914 = vmatprep.subr.bf16.mxu0 %v2186_v14 }
  0xf6   :  { %1693 = vmatpush3.bf16.msra.mxu1 %v2154_v8  ;;  %1915 = vmatpush3.bf16.msra.mxu0 %v2186_v14 }
  0xf7   :  { %1694 = vmatprep.subr.bf16.mxu1 %v2165_v10  ;;  %1916 = vmatprep.subr.bf16.mxu0 %v2205_v17 }
  0xf8   :  { %1529 = vmatmul.mubr.msk.bf16.gmra.mrb[4].mxu1 %vm2377_vm11, %v1528_v36 }
  0xfa   :  { %1695 = vmatpush3.bf16.msra.mxu1 %v2171_v11  ;;  %1917 = vmatpush3.bf16.msra.mxu0 %v2205_v17 }
  0xfb   :  { %1696 = vmatprep.subr.bf16.mxu1 %v2180_v13  ;;  %1918 = vmatprep.subr.bf16.mxu0 %v2222_v20 }
  0xfe   :  { %1697 = vmatpush3.bf16.msra.mxu1 %v2192_v15  ;;  %1919 = vmatpush3.bf16.msra.mxu0 %v2222_v20 }
  0xff   :  { %1698 = vmatprep.subr.bf16.mxu1 %v2199_v16  ;;  %1920 = vmatprep.subr.bf16.mxu0 %v2234_v21 }
 0x102   :  { %1699 = vmatpush3.bf16.msra.mxu1 %v2211_v18  ;;  %1921 = vmatpush3.bf16.msra.mxu0 %v2234_v21 }
 0x103   :  { %1700 = vmatprep.subr.bf16.mxu1 %v2217_v19  ;;  %1922 = vmatprep.subr.bf16.mxu0 %v2247_v23 }
 0x106   :  { %1701 = vmatpush3.bf16.msra.mxu1 %v2242_v22  ;;  %1923 = vmatpush3.bf16.msra.mxu0 %v2247_v23 }
 0x107   :  { %1702 = vmatprep.subr.bf16.mxu1 %v2255_v24  ;;  %1924 = vmatprep.subr.bf16.mxu0 %v2265_v26 }
 0x10a   :  { %1703 = vmatpush3.bf16.msra.mxu1 %v2260_v25  ;;  %1925 = vmatpush3.bf16.msra.mxu0 %v2265_v26 }
 0x10b   :  { %1704 = vmatprep.subr.bf16.mxu1 %v2273_v27  ;;  %1926 = vmatprep.subr.bf16.mxu0 %v2285_v29 }
 0x10e   :  { %1705 = vmatpush3.bf16.msra.mxu1 %v2278_v28  ;;  %1927 = vmatpush3.bf16.msra.mxu0 %v2285_v29 }
 0x10f   :  { %1728 = vmatprep.subr.bf16.mxu1 %v2134_v4  ;;  %1932 = vmatprep.subr.bf16.mxu0 %v2159_v9  ;;  %v2419_v4 = vld [vmem:[%s2902_s5] ss:$0 sm:$0xff] }
 0x1c3   :  { %v1668_v37 = vpop.f32.mrb[0].mxu1 }
 0x1c4   :  { %v1669_v39 = vpop.f32.mrb[1].mxu1  ;;  %v1910_v41 = vpop.f32.mrb[4].mxu0 }
 0x1c5   :  { %v1670_v42 = vadd.f32 %v1669_v39, %v1668_v37  ;;  %v1671_v44 = vpop.f32.mrb[2].mxu1  ;;  %v538_v45 = vpop.f32.mrb[5].mxu0 }
 0x1c6   :  { %v1672_v48 = vpop.f32.mrb[3].mxu1  ;;  %v1911_v49 = vpop.f32.mrb[6].mxu0 }
 0x1c7   :  { %v539_v50 = vadd.f32 %v1670_v42, %v538_v45  ;;  %v1673_v51 = vadd.f32 %v1672_v48, %v1671_v44  ;;  %v541_v52 = vpop.f32.mrb[7].mxu0 }
 0x1c9   :  { %v553_v53 = vmul.f32 %v2414_v47, %v539_v50  ;;  %v542_v54 = vadd.f32 %v1673_v51, %v541_v52 }
 0x1cb   :  { %v557_v55 = vadd.f32 %v2419_v4, %v553_v53  ;;  %v554_v56 = vmul.f32 %v2414_v47, %v542_v54  ;;  %v1674_v57 = vpop.f32.mrb[4].mxu1 }
 0x1cc   :  { %v1675_v59 = vpop.f32.mrb[5].mxu1 }
 0x1cd   :  { %v561_v60 = vmax.f32 %v557_v55, 0.0  ;;  %v558_v61 = vadd.f32 %v2419_v4, %v554_v56  ;;  %v1676_v62 = vadd.f32 %v1675_v59, %v1674_v57  ;;  %v1677_v63 = vpop.f32.mrb[6].mxu1 }
 0x1ce   :  { %v1678_v1 = vpop.f32.mrb[7].mxu1 }
 0x1cf   :  { %v565_v2 = vadd.f32 %v561_v60, %v2302_v40  ;;  %v562_v6 = vmax.f32 %v558_v61, 0.0  ;;  %v547_v12 = vadd.f32 %v1910_v41, %v1676_v62  ;;  %v1679_v30 = vadd.f32 %v1678_v1, %v1677_v63 }
 0x1d1   :  { %v566_v32 = vadd.f32 %v562_v6, %v2312_v46  ;;  %v555_v33 = vmul.f32 %v2414_v47, %v547_v12  ;;  %v569_v34 = vrot.slane %v565_v2, 7  ;;  %v581_v36 = vrot.slane %v565_v2, 1 }
 0x1d2   :  { %v550_v37 = vadd.f32 %v1911_v49, %v1679_v30 }
 0x1d3   :  { %v570_v39 = vrot.slane %v566_v32, 7  ;;  %v582_v42 = vrot.slane %v566_v32, 1  ;;  %v559_v44 = vadd.f32 %v2419_v4, %v555_v33  ;;  %v594_v45 = vpack.c.bf16 %v566_v32, %v565_v2 }
 0x1d4   :  { %v556_v48 = vmul.f32 %v2414_v47, %v550_v37 }
 0x1d5   :  { %v575_v50 = vsel %vm235_vm1, %v569_v34, %v570_v39  ;;  %v563_v51 = vmax.f32 %v559_v44, 0.0  ;;  %631 = vmatprep.mubr.bf16.mxu1 %v594_v45  ;;  %v587_v41 = vsel %vm248_vm2, %v581_v36, %v582_v42 }
 0x1d6   :  { %v560_v52 = vadd.f32 %v2419_v4, %v556_v48 }
 0x1d7   :  { %v567_v53 = vadd.f32 %v563_v51, %v2300_v38 }
 0x1d8   :  { %v564_v49 = vmax.f32 %v560_v52, 0.0 }
 0x1d9   :  { %v583_v54 = vrot.slane %v567_v53, 1  ;;  %v571_v55 = vrot.slane %v567_v53, 7 }
 0x1da   :  { %v568_v56 = vadd.f32 %v564_v49, %v2305_v43 }
 0x1db   :  { %v586_v57 = vsel %vm248_vm2, %v582_v42, %v583_v54  ;;  %v574_v59 = vsel %vm235_vm1, %v570_v39, %v571_v55 }
 0x1dc   :  { %v572_v60 = vrot.slane %v568_v56, 7  ;;  %v584_v61 = vrot.slane %v568_v56, 1  ;;  %v1548_v62 = vpack.c.bf16 %v586_v57, %v587_v41  ;;  %v597_v63 = vpack.c.bf16 %v568_v56, %v567_v53 }
 0x1de   :  { %v576_v1 = vsel %vm235_vm1, %v572_v60, %v569_v34  ;;  %1928 = vmatprep.mubr.msk.bf16.mxu0 %vm2350_vm8, %v1548_v62  ;;  %v585_v2 = vsel %vm248_vm2, %v583_v54, %v584_v61  ;;  %v588_v6 = vsel %vm248_vm2, %v584_v61, %v581_v36  ;;  %v573_v12 = vsel %vm235_vm1, %v571_v55, %v572_v60 }
 0x1df   :  { %v1540_v30 = vpack.c.bf16 %v575_v50, %v576_v1  ;;  %v1552_v32 = vpack.c.bf16 %v588_v6, %v585_v2  ;;  %v1544_v33 = vpack.c.bf16 %v573_v12, %v574_v59 }
 0x1e1   :  { %1541 = vmatmul.mubr.msk.bf16.vlgmr.msra.gmra.mrb[8].mxu1 %vm2333_vm7, %v1540_v30  ;;  %1929 = vmatmul.mubr.msk.bf16.vlgmr.msra.gmra.mrb[8].mxu0 %vm2355_vm9, %v1552_v32 }
 0x1e2   :  { %639 = vmatprep.mubr.bf16.mxu1 %v597_v63  ;;  %1729 = vmatpush3.bf16.msra.mxu1 %v2139_v5  ;;  %v2490_v5 = vld [vmem:[%s2903_s6 + $0x40] sm:$0xff]  }
 0x1e3   :  { %1933 = vmatpush3.bf16.msra.mxu0 %v2159_v9  ;;  %1730 = vmatprep.subr.bf16.mxu1 %v2149_v7  ;;  %v2495_v7 = vld [vmem:[%s2903_s6 + $0x80] sm:$0xff]  }
 0x1e4   :  { %1934 = vmatprep.subr.bf16.mxu0 %v2186_v14 }
 0x1e6   :  { %1731 = vmatpush3.bf16.msra.mxu1 %v2154_v8 }
 0x1e7   :  { %1935 = vmatpush3.bf16.msra.mxu0 %v2186_v14  ;;  %1732 = vmatprep.subr.bf16.mxu1 %v2165_v10 }
 0x1e8   :  { %1936 = vmatprep.subr.bf16.mxu0 %v2205_v17 }
 0x1e9   :  { %1545 = vmatmul.mubr.msk.bf16.gmra.mrb[12].mxu1 %vm2377_vm11, %v1544_v33 }
 0x1ea   :  { %1733 = vmatpush3.bf16.msra.mxu1 %v2171_v11 }
 0x1eb   :  { %1937 = vmatpush3.bf16.msra.mxu0 %v2205_v17  ;;  %1734 = vmatprep.subr.bf16.mxu1 %v2180_v13 }
 0x1ec   :  { %1938 = vmatprep.subr.bf16.mxu0 %v2222_v20 }
 0x1ee   :  { %1735 = vmatpush3.bf16.msra.mxu1 %v2192_v15 }
 0x1ef   :  { %1939 = vmatpush3.bf16.msra.mxu0 %v2222_v20  ;;  %1736 = vmatprep.subr.bf16.mxu1 %v2199_v16 }
 0x1f0   :  { %1940 = vmatprep.subr.bf16.mxu0 %v2234_v21 }
 0x1f2   :  { %1737 = vmatpush3.bf16.msra.mxu1 %v2211_v18 }
 0x1f3   :  { %1941 = vmatpush3.bf16.msra.mxu0 %v2234_v21  ;;  %1738 = vmatprep.subr.bf16.mxu1 %v2217_v19 }
 0x1f4   :  { %1942 = vmatprep.subr.bf16.mxu0 %v2247_v23 }
 0x1f6   :  { %1739 = vmatpush3.bf16.msra.mxu1 %v2242_v22 }
 0x1f7   :  { %1943 = vmatpush3.bf16.msra.mxu0 %v2247_v23  ;;  %1740 = vmatprep.subr.bf16.mxu1 %v2255_v24 }
 0x1f8   :  { %1944 = vmatprep.subr.bf16.mxu0 %v2265_v26 }
 0x1fa   :  { %1741 = vmatpush3.bf16.msra.mxu1 %v2260_v25 }
 0x1fb   :  { %1945 = vmatpush3.bf16.msra.mxu0 %v2265_v26  ;;  %1742 = vmatprep.subr.bf16.mxu1 %v2273_v27 }
 0x1fc   :  { %1946 = vmatprep.subr.bf16.mxu0 %v2285_v29 }
 0x1fe   :  { %1743 = vmatpush3.bf16.msra.mxu1 %v2278_v28 }
 0x1ff   :  { %1947 = vmatpush3.bf16.msra.mxu0 %v2285_v29  ;;  %1766 = vmatprep.subr.bf16.mxu1 %v2490_v5 }
 0x200   :  { %1952 = vmatprep.subr.bf16.mxu0 %v2495_v7 }
 0x2b4   :  { %v1706_v8 = vpop.f32.mrb[8].mxu1  ;;  %v1930_v9 = vpop.f32.mrb[8].mxu0 }
 0x2b5   :  { %v1707_v10 = vpop.f32.mrb[9].mxu1  ;;  %v682_v11 = vpop.f32.mrb[9].mxu0 }
 0x2b6   :  { %v1708_v13 = vadd.f32 %v1707_v10, %v1706_v8  ;;  %v1709_v14 = vpop.f32.mrb[10].mxu1  ;;  %v1931_v15 = vpop.f32.mrb[10].mxu0 }
 0x2b7   :  { %v1710_v16 = vpop.f32.mrb[11].mxu1  ;;  %v685_v17 = vpop.f32.mrb[11].mxu0 }
 0x2b8   :  { %v683_v18 = vadd.f32 %v1708_v13, %v682_v11  ;;  %v1711_v19 = vadd.f32 %v1710_v16, %v1709_v14  ;;  %v2532_v13 = vld [vmem:[%s2903_s6] sm:$0xff]  }
 0x2ba   :  { %v697_v20 = vmul.f32 %v2414_v47, %v683_v18  ;;  %v686_v21 = vadd.f32 %v1711_v19, %v685_v17  ;;  %v2537_v17 = vld [vmem:[%s2903_s6 + $0x48] sm:$0xff]  }
 0x2bb   :  { %v2542_v18 = vld [vmem:[%s2903_s6 + $0x88] sm:$0xff]  }
 0x2bc   :  { %v701_v22 = vadd.f32 %v2419_v4, %v697_v20  ;;  %v698_v23 = vmul.f32 %v2414_v47, %v686_v21  ;;  %v1712_v24 = vpop.f32.mrb[12].mxu1  ;;  %v2558_v19 = vld [vmem:[%s2903_s6 + $0x8] sm:$0xff]   ;;  %v2564_v20 = vld [vmem:[%s2903_s6 + $0x50] sm:$0xff]  }
 0x2bd   :  { %v1713_v25 = vpop.f32.mrb[13].mxu1  ;;  %v2569_v21 = vld [vmem:[%s2903_s6 + $0x90] sm:$0xff]  }
 0x2be   :  { %v705_v26 = vmax.f32 %v701_v22, 0.0  ;;  %v702_v27 = vadd.f32 %v2419_v4, %v698_v23  ;;  %v1714_v28 = vadd.f32 %v1713_v25, %v1712_v24  ;;  %v1715_v29 = vpop.f32.mrb[14].mxu1  ;;  %v2574_v22 = vld [vmem:[%s2903_s6 + $0x10] sm:$0xff]   ;;  %v2583_v23 = vld [vmem:[%s2903_s6 + $0x58] sm:$0xff]  }
 0x2bf   :  { %v1716_v34 = vpop.f32.mrb[15].mxu1  ;;  %v2588_v24 = vld [vmem:[%s2903_s6 + $0x98] sm:$0xff]  }
 0x2c0   :  { %v709_v36 = vadd.f32 %v705_v26, %v2302_v40  ;;  %v706_v37 = vmax.f32 %v702_v27, 0.0  ;;  %v691_v39 = vadd.f32 %v1930_v9, %v1714_v28  ;;  %v1717_v42 = vadd.f32 %v1716_v34, %v1715_v29  ;;  %v2593_v25 = vld [vmem:[%s2903_s6 + $0x18] sm:$0xff]   ;;  %v2602_v26 = vld [vmem:[%s2903_s6 + $0x60] sm:$0xff]   ;;  %v2621_v29 = vld [vmem:[%s2903_s6 + $0x68] sm:$0xff]  }
 0x2c1   :  { %v2607_v27 = vld [vmem:[%s2903_s6 + $0xa0] sm:$0xff]   ;;  %v2626_v34 = vld [vmem:[%s2903_s6 + $0xa8] sm:$0xff]  }
 0x2c2   :  { %v710_v44 = vadd.f32 %v706_v37, %v2312_v46  ;;  %v699_v45 = vmul.f32 %v2414_v47, %v691_v39  ;;  %v713_v48 = vrot.slane %v709_v36, 7  ;;  %v725_v50 = vrot.slane %v709_v36, 1  ;;  %v2612_v28 = vld [vmem:[%s2903_s6 + $0x20] sm:$0xff]   ;;  %v2640_v37 = vld [vmem:[%s2903_s6 + $0x70] sm:$0xff]  }
 0x2c3   :  { %v694_v51 = vadd.f32 %v1931_v15, %v1717_v42  ;;  %v2645_v39 = vld [vmem:[%s2903_s6 + $0xb0] sm:$0xff]  }
 0x2c4   :  { %v714_v41 = vrot.slane %v710_v44, 7  ;;  %v726_v52 = vrot.slane %v710_v44, 1  ;;  %v703_v53 = vadd.f32 %v2419_v4, %v699_v45  ;;  %v738_v49 = vpack.c.bf16 %v710_v44, %v709_v36  ;;  %v2631_v36 = vld [vmem:[%s2903_s6 + $0x28] sm:$0xff]   ;;  %v2650_v42 = vld [vmem:[%s2903_s6 + $0x30] sm:$0xff]   ;;  %v2659_v44 = vld [vmem:[%s2903_s6 + $0x78] sm:$0xff]  }
 0x2c5   :  { %v700_v54 = vmul.f32 %v2414_v47, %v694_v51  ;;  %v2664_v45 = vld [vmem:[%s2903_s6 + $0xb8] sm:$0xff]  }
 0x2c6   :  { %v719_v55 = vsel %vm235_vm1, %v713_v48, %v714_v41  ;;  %v707_v56 = vmax.f32 %v703_v53, 0.0  ;;  %775 = vmatprep.mubr.bf16.mxu1 %v738_v49  ;;  %v731_v57 = vsel %vm248_vm2, %v725_v50, %v726_v52 }
 0x2c7   :  { %v704_v59 = vadd.f32 %v2419_v4, %v700_v54 }
 0x2c8   :  { %v711_v60 = vadd.f32 %v707_v56, %v2300_v38 }
 0x2c9   :  { %v708_v61 = vmax.f32 %v704_v59, 0.0 }
 0x2ca   :  { %v727_v62 = vrot.slane %v711_v60, 1  ;;  %v715_v63 = vrot.slane %v711_v60, 7 }
 0x2cb   :  { %v712_v1 = vadd.f32 %v708_v61, %v2305_v43 }
 0x2cc   :  { %v730_v2 = vsel %vm248_vm2, %v726_v52, %v727_v62  ;;  %v718_v6 = vsel %vm235_vm1, %v714_v41, %v715_v63 }
 0x2cd   :  { %v716_v12 = vrot.slane %v712_v1, 7  ;;  %v728_v30 = vrot.slane %v712_v1, 1  ;;  %v1564_v32 = vpack.c.bf16 %v730_v2, %v731_v57  ;;  %v741_v33 = vpack.c.bf16 %v712_v1, %v711_v60 }
 0x2cf   :  { %v720_v8 = vsel %vm235_vm1, %v716_v12, %v713_v48  ;;  %1948 = vmatprep.mubr.msk.bf16.mxu0 %vm2350_vm8, %v1564_v32  ;;  %v729_v9 = vsel %vm248_vm2, %v727_v62, %v728_v30  ;;  %v732_v10 = vsel %vm248_vm2, %v728_v30, %v725_v50  ;;  %v717_v11 = vsel %vm235_vm1, %v715_v63, %v716_v12  ;;  %v2669_v48 = vld [vmem:[%s2903_s6 + $0x38] sm:$0xff]  }
 0x2d0   :  { %v1556_v14 = vpack.c.bf16 %v719_v55, %v720_v8  ;;  %v1568_v15 = vpack.c.bf16 %v732_v10, %v729_v9  ;;  %v1560_v16 = vpack.c.bf16 %v717_v11, %v718_v6 }
 0x2d2   :  { %1557 = vmatmul.mubr.msk.bf16.vlgmr.msra.gmra.mrb[16].mxu1 %vm2333_vm7, %v1556_v14  ;;  %1949 = vmatmul.mubr.msk.bf16.vlgmr.msra.gmra.mrb[12].mxu0 %vm2355_vm9, %v1568_v15 }
 0x2d3   :  { %783 = vmatprep.mubr.bf16.mxu1 %v741_v33  ;;  %1767 = vmatpush3.bf16.msra.mxu1 %v2532_v13 }
 0x2d4   :  { %1953 = vmatpush3.bf16.msra.mxu0 %v2495_v7  ;;  %1768 = vmatprep.subr.bf16.mxu1 %v2537_v17 }
 0x2d5   :  { %1954 = vmatprep.subr.bf16.mxu0 %v2542_v18 }
 0x2d7   :  { %1769 = vmatpush3.bf16.msra.mxu1 %v2558_v19 }
 0x2d8   :  { %1955 = vmatpush3.bf16.msra.mxu0 %v2542_v18  ;;  %1770 = vmatprep.subr.bf16.mxu1 %v2564_v20 }
 0x2d9   :  { %1956 = vmatprep.subr.bf16.mxu0 %v2569_v21 }
 0x2da   :  { %1561 = vmatmul.mubr.msk.bf16.gmra.mrb[20].mxu1 %vm2377_vm11, %v1560_v16 }
 0x2db   :  { %1771 = vmatpush3.bf16.msra.mxu1 %v2574_v22 }
 0x2dc   :  { %1957 = vmatpush3.bf16.msra.mxu0 %v2569_v21  ;;  %1772 = vmatprep.subr.bf16.mxu1 %v2583_v23 }
 0x2dd   :  { %1958 = vmatprep.subr.bf16.mxu0 %v2588_v24 }
 0x2df   :  { %1773 = vmatpush3.bf16.msra.mxu1 %v2593_v25 }
 0x2e0   :  { %1959 = vmatpush3.bf16.msra.mxu0 %v2588_v24  ;;  %1774 = vmatprep.subr.bf16.mxu1 %v2602_v26 }
 0x2e1   :  { %1960 = vmatprep.subr.bf16.mxu0 %v2607_v27 }
 0x2e3   :  { %1775 = vmatpush3.bf16.msra.mxu1 %v2612_v28 }
 0x2e4   :  { %1961 = vmatpush3.bf16.msra.mxu0 %v2607_v27  ;;  %1776 = vmatprep.subr.bf16.mxu1 %v2621_v29 }
 0x2e5   :  { %1962 = vmatprep.subr.bf16.mxu0 %v2626_v34 }
 0x2e7   :  { %1777 = vmatpush3.bf16.msra.mxu1 %v2631_v36 }
 0x2e8   :  { %1963 = vmatpush3.bf16.msra.mxu0 %v2626_v34  ;;  %1778 = vmatprep.subr.bf16.mxu1 %v2640_v37 }
 0x2e9   :  { %1964 = vmatprep.subr.bf16.mxu0 %v2645_v39 }
 0x2eb   :  { %1779 = vmatpush3.bf16.msra.mxu1 %v2650_v42 }
 0x2ec   :  { %1965 = vmatpush3.bf16.msra.mxu0 %v2645_v39  ;;  %1780 = vmatprep.subr.bf16.mxu1 %v2659_v44 }
 0x2ed   :  { %1966 = vmatprep.subr.bf16.mxu0 %v2664_v45 }
 0x2ef   :  { %1781 = vmatpush3.bf16.msra.mxu1 %v2669_v48 }
 0x2f0   :  { %1967 = vmatpush3.bf16.msra.mxu0 %v2664_v45  ;;  %1804 = vmatprep.subr.bf16.mxu1 %v2490_v5 }
 0x2f1   :  { %1972 = vmatprep.subr.bf16.mxu0 %v2495_v7 }
 0x3a5   :  { %v1744_v50 = vpop.f32.mrb[16].mxu1  ;;  %v1950_v51 = vpop.f32.mrb[12].mxu0 }
 0x3a6   :  { %v1745_v41 = vpop.f32.mrb[17].mxu1  ;;  %v826_v52 = vpop.f32.mrb[13].mxu0 }
 0x3a7   :  { %v1746_v53 = vadd.f32 %v1745_v41, %v1744_v50  ;;  %v1747_v49 = vpop.f32.mrb[18].mxu1  ;;  %v1951_v54 = vpop.f32.mrb[14].mxu0 }
 0x3a8   :  { %v1748_v55 = vpop.f32.mrb[19].mxu1  ;;  %v829_v56 = vpop.f32.mrb[15].mxu0 }
 0x3a9   :  { %v827_v57 = vadd.f32 %v1746_v53, %v826_v52  ;;  %v1749_v59 = vadd.f32 %v1748_v55, %v1747_v49 }
 0x3ab   :  { %v841_v60 = vmul.f32 %v2414_v47, %v827_v57  ;;  %v830_v61 = vadd.f32 %v1749_v59, %v829_v56 }
 0x3ad   :  { %v845_v62 = vadd.f32 %v2419_v4, %v841_v60  ;;  %v842_v63 = vmul.f32 %v2414_v47, %v830_v61  ;;  %v1750_v1 = vpop.f32.mrb[20].mxu1 }
 0x3ae   :  { %v1751_v2 = vpop.f32.mrb[21].mxu1 }
 0x3af   :  { %v846_v6 = vadd.f32 %v2419_v4, %v842_v63  ;;  %v1752_v12 = vadd.f32 %v1751_v2, %v1750_v1  ;;  %v1753_v30 = vpop.f32.mrb[22].mxu1  ;;  %v2681_v33 = vmax.f32 %v845_v62, 0.0 }
 0x3b0   :  { %v1754_v32 = vpop.f32.mrb[23].mxu1 }
 0x3b1   :  { %v2683_v8 = vmax.f32 %v846_v6, 0.0  ;;  %v835_v9 = vadd.f32 %v1950_v51, %v1752_v12  ;;  %v1755_v10 = vadd.f32 %v1754_v32, %v1753_v30  ;;  %v853_v56 = vrot.slane %v2681_v33, 7 }
 0x3b3   :  { %v843_v11 = vmul.f32 %v2414_v47, %v835_v9  ;;  %v838_v14 = vadd.f32 %v1951_v54, %v1755_v10  ;;  %v878_v15 = vpack.c.bf16 %v2683_v8, %v2681_v33  ;;  %v866_v53 = vrot.slane %v2683_v8, 1 }
 0x3b4   :  { %v854_v51 = vrot.slane %v2683_v8, 7  ;;  %v865_v54 = vrot.slane %v2681_v33, 1 }
 0x3b5   :  { %v847_v16 = vadd.f32 %v2419_v4, %v843_v11  ;;  %v844_v50 = vmul.f32 %v2414_v47, %v838_v14  ;;  %1107 = vmatprep.mubr.bf16.mxu1 %v878_v15 }
 0x3b6   :  { %v859_v61 = vsel %vm235_vm1, %v853_v56, %v854_v51 }
 0x3b7   :  { %v2690_v41 = vmax.f32 %v847_v16, 0.0  ;;  %v848_v52 = vadd.f32 %v2419_v4, %v844_v50  ;;  %v871_v4 = vsel %vm248_vm2, %v865_v54, %v866_v53 }
 0x3b9   :  { %v2695_v49 = vmax.f32 %v848_v52, 0.0  ;;  %v867_v55 = vrot.slane %v2690_v41, 1  ;;  %v855_v30 = vrot.slane %v2690_v41, 7 }
 0x3bb   :  { %v856_v57 = vrot.slane %v2695_v49, 7  ;;  %v870_v47 = vsel %vm248_vm2, %v866_v53, %v867_v55  ;;  %v868_v59 = vrot.slane %v2695_v49, 1  ;;  %v881_v12 = vpack.c.bf16 %v2695_v49, %v2690_v41 }
 0x3bc   :  { %v1604_v60 = vpack.c.bf16 %v870_v47, %v871_v4  ;;  %v858_v9 = vsel %vm235_vm1, %v854_v51, %v855_v30  ;;  %v2764_v51 = vld [vmem:[%s2904_s7] ss:$0 sm:$0xff] }
 0x3bd   :  { %v860_v62 = vsel %vm235_vm1, %v856_v57, %v853_v56  ;;  %v869_v63 = vsel %vm248_vm2, %v867_v55, %v868_v59  ;;  %v872_v1 = vsel %vm248_vm2, %v868_v59, %v865_v54  ;;  %v857_v32 = vsel %vm235_vm1, %v855_v30, %v856_v57 }
 0x3be   :  { %1968 = vmatprep.mubr.msk.bf16.mxu0 %vm2350_vm8, %v1604_v60  ;;  %v1596_v2 = vpack.c.bf16 %v859_v61, %v860_v62  ;;  %v1608_v6 = vpack.c.bf16 %v872_v1, %v869_v63  ;;  %v1600_v10 = vpack.c.bf16 %v857_v32, %v858_v9 }
 0x3c0   :  { %1597 = vmatmul.mubr.msk.bf16.vlgmr.msra.gmra.mrb[24].mxu1 %vm2333_vm7, %v1596_v2  ;;  %1969 = vmatmul.mubr.msk.bf16.vlgmr.msra.gmra.mrb[16].mxu0 %vm2355_vm9, %v1608_v6 }
 0x3c1   :  { %1115 = vmatprep.mubr.bf16.mxu1 %v881_v12  ;;  %1805 = vmatpush3.bf16.msra.mxu1 %v2532_v13 }
 0x3c2   :  { %1973 = vmatpush3.bf16.msra.mxu0 %v2495_v7  ;;  %1806 = vmatprep.subr.bf16.mxu1 %v2537_v17 }
 0x3c3   :  { %1974 = vmatprep.subr.bf16.mxu0 %v2542_v18 }
 0x3c5   :  { %1807 = vmatpush3.bf16.msra.mxu1 %v2558_v19 }
 0x3c6   :  { %1975 = vmatpush3.bf16.msra.mxu0 %v2542_v18  ;;  %1808 = vmatprep.subr.bf16.mxu1 %v2564_v20 }
 0x3c7   :  { %1976 = vmatprep.subr.bf16.mxu0 %v2569_v21 }
 0x3c8   :  { %1601 = vmatmul.mubr.msk.bf16.gmra.mrb[28].mxu1 %vm2377_vm11, %v1600_v10 }
 0x3c9   :  { %1809 = vmatpush3.bf16.msra.mxu1 %v2574_v22 }
 0x3ca   :  { %1977 = vmatpush3.bf16.msra.mxu0 %v2569_v21  ;;  %1810 = vmatprep.subr.bf16.mxu1 %v2583_v23 }
 0x3cb   :  { %1978 = vmatprep.subr.bf16.mxu0 %v2588_v24 }
 0x3cd   :  { %1811 = vmatpush3.bf16.msra.mxu1 %v2593_v25 }
 0x3ce   :  { %1979 = vmatpush3.bf16.msra.mxu0 %v2588_v24  ;;  %1812 = vmatprep.subr.bf16.mxu1 %v2602_v26 }
 0x3cf   :  { %1980 = vmatprep.subr.bf16.mxu0 %v2607_v27 }
 0x3d1   :  { %1813 = vmatpush3.bf16.msra.mxu1 %v2612_v28 }
 0x3d2   :  { %1981 = vmatpush3.bf16.msra.mxu0 %v2607_v27  ;;  %1814 = vmatprep.subr.bf16.mxu1 %v2621_v29 }
 0x3d3   :  { %1982 = vmatprep.subr.bf16.mxu0 %v2626_v34 }
 0x3d5   :  { %1815 = vmatpush3.bf16.msra.mxu1 %v2631_v36 }
 0x3d6   :  { %1983 = vmatpush3.bf16.msra.mxu0 %v2626_v34  ;;  %1816 = vmatprep.subr.bf16.mxu1 %v2640_v37 }
 0x3d7   :  { %1984 = vmatprep.subr.bf16.mxu0 %v2645_v39 }
 0x3d9   :  { %1817 = vmatpush3.bf16.msra.mxu1 %v2650_v42 }
 0x3da   :  { %1985 = vmatpush3.bf16.msra.mxu0 %v2645_v39  ;;  %1818 = vmatprep.subr.bf16.mxu1 %v2659_v44 }
 0x3db   :  { %1986 = vmatprep.subr.bf16.mxu0 %v2664_v45 }
 0x3dd   :  { %1819 = vmatpush3.bf16.msra.mxu1 %v2669_v48 }
 0x3de   :  { %1987 = vmatpush3.bf16.msra.mxu0 %v2664_v45  ;;  %1842 = vmatprep.subr.bf16.mxu1 %v2490_v5  ;;  %v2769_v5 = vld [vmem:[%s2905_s8] ss:$0 sm:$0xff] }
 0x3df   :  { %1992 = vmatprep.subr.bf16.mxu0 %v2495_v7 }
 0x493   :  { %v1782_v11 = vpop.f32.mrb[24].mxu1  ;;  %v1970_v14 = vpop.f32.mrb[16].mxu0 }
 0x494   :  { %v1783_v15 = vpop.f32.mrb[25].mxu1  ;;  %v1158_v16 = vpop.f32.mrb[17].mxu0 }
 0x495   :  { %v1784_v50 = vadd.f32 %v1783_v15, %v1782_v11  ;;  %v1785_v52 = vpop.f32.mrb[26].mxu1  ;;  %v1971_v53 = vpop.f32.mrb[18].mxu0 }
 0x496   :  { %v1786_v54 = vpop.f32.mrb[27].mxu1  ;;  %v1161_v55 = vpop.f32.mrb[19].mxu0 }
 0x497   :  { %v1159_v56 = vadd.f32 %v1784_v50, %v1158_v16  ;;  %v1787_v57 = vadd.f32 %v1786_v54, %v1785_v52 }
 0x499   :  { %v1173_v47 = vmul.f32 %v2764_v51, %v1159_v56  ;;  %v1162_v4 = vadd.f32 %v1787_v57, %v1161_v55 }
 0x49b   :  { %v1177_v59 = vadd.f32 %v2769_v5, %v1173_v47  ;;  %v1174_v60 = vmul.f32 %v2764_v51, %v1162_v4  ;;  %v1788_v61 = vpop.f32.mrb[28].mxu1 }
 0x49c   :  { %v1789_v62 = vpop.f32.mrb[29].mxu1 }
 0x49d   :  { %v1181_v63 = vmax.f32 %v1177_v59, 0.0  ;;  %v1178_v1 = vadd.f32 %v2769_v5, %v1174_v60  ;;  %v1790_v2 = vadd.f32 %v1789_v62, %v1788_v61  ;;  %v1791_v6 = vpop.f32.mrb[30].mxu1 }
 0x49e   :  { %v1792_v12 = vpop.f32.mrb[31].mxu1 }
 0x49f   :  { %v1185_v30 = vadd.f32 %v1181_v63, %v2681_v33  ;;  %v1182_v32 = vmax.f32 %v1178_v1, 0.0  ;;  %v1167_v9 = vadd.f32 %v1970_v14, %v1790_v2  ;;  %v1793_v10 = vadd.f32 %v1792_v12, %v1791_v6 }
 0x4a1   :  { %v1186_v11 = vadd.f32 %v1182_v32, %v2683_v8  ;;  %v1175_v15 = vmul.f32 %v2764_v51, %v1167_v9  ;;  %v1189_v16 = vrot.slane %v1185_v30, 7  ;;  %v1201_v50 = vrot.slane %v1185_v30, 1 }
 0x4a2   :  { %v1170_v52 = vadd.f32 %v1971_v53, %v1793_v10 }
 0x4a3   :  { %v1190_v54 = vrot.slane %v1186_v11, 7  ;;  %v1202_v55 = vrot.slane %v1186_v11, 1  ;;  %v1179_v56 = vadd.f32 %v2769_v5, %v1175_v15  ;;  %v1214_v57 = vpack.c.bf16 %v1186_v11, %v1185_v30 }
 0x4a4   :  { %v1176_v47 = vmul.f32 %v2764_v51, %v1170_v52 }
 0x4a5   :  { %v1195_v4 = vsel %vm235_vm1, %v1189_v16, %v1190_v54  ;;  %v1183_v59 = vmax.f32 %v1179_v56, 0.0  ;;  %1251 = vmatprep.mubr.bf16.mxu1 %v1214_v57  ;;  %v1207_v14 = vsel %vm248_vm2, %v1201_v50, %v1202_v55 }
 0x4a6   :  { %v1180_v60 = vadd.f32 %v2769_v5, %v1176_v47 }
 0x4a7   :  { %v1187_v61 = vadd.f32 %v1183_v59, %v2690_v41 }
 0x4a8   :  { %v1184_v53 = vmax.f32 %v1180_v60, 0.0 }
 0x4a9   :  { %v1203_v62 = vrot.slane %v1187_v61, 1  ;;  %v1191_v63 = vrot.slane %v1187_v61, 7 }
 0x4aa   :  { %v1188_v1 = vadd.f32 %v1184_v53, %v2695_v49 }
 0x4ab   :  { %v1206_v2 = vsel %vm248_vm2, %v1202_v55, %v1203_v62  ;;  %v1194_v6 = vsel %vm235_vm1, %v1190_v54, %v1191_v63 }
 0x4ac   :  { %v1192_v12 = vrot.slane %v1188_v1, 7  ;;  %v1204_v30 = vrot.slane %v1188_v1, 1  ;;  %v1620_v32 = vpack.c.bf16 %v1206_v2, %v1207_v14  ;;  %v1217_v9 = vpack.c.bf16 %v1188_v1, %v1187_v61 }
 0x4ae   :  { %v1196_v10 = vsel %vm235_vm1, %v1192_v12, %v1189_v16  ;;  %1988 = vmatprep.mubr.msk.bf16.mxu0 %vm2350_vm8, %v1620_v32  ;;  %v1205_v11 = vsel %vm248_vm2, %v1203_v62, %v1204_v30  ;;  %v1208_v15 = vsel %vm248_vm2, %v1204_v30, %v1201_v50  ;;  %v1193_v52 = vsel %vm235_vm1, %v1191_v63, %v1192_v12 }
 0x4af   :  { %v1612_v54 = vpack.c.bf16 %v1195_v4, %v1196_v10  ;;  %v1624_v55 = vpack.c.bf16 %v1208_v15, %v1205_v11  ;;  %v1616_v56 = vpack.c.bf16 %v1193_v52, %v1194_v6 }
 0x4b1   :  { %1613 = vmatmul.mubr.msk.bf16.vlgmr.msra.gmra.mrb[32].mxu1 %vm2333_vm7, %v1612_v54  ;;  %1989 = vmatmul.mubr.msk.bf16.vlgmr.msra.gmra.mrb[20].mxu0 %vm2355_vm9, %v1624_v55 }
 0x4b2   :  { %1259 = vmatprep.mubr.bf16.mxu1 %v1217_v9  ;;  %1843 = vmatpush3.bf16.msra.mxu1 %v2532_v13 }
 0x4b3   :  { %1993 = vmatpush3.bf16.msra.mxu0 %v2495_v7  ;;  %1844 = vmatprep.subr.bf16.mxu1 %v2537_v17 }
 0x4b4   :  { %1994 = vmatprep.subr.bf16.mxu0 %v2542_v18 }
 0x4b6   :  { %1845 = vmatpush3.bf16.msra.mxu1 %v2558_v19 }
 0x4b7   :  { %1995 = vmatpush3.bf16.msra.mxu0 %v2542_v18  ;;  %1846 = vmatprep.subr.bf16.mxu1 %v2564_v20 }
 0x4b8   :  { %1996 = vmatprep.subr.bf16.mxu0 %v2569_v21 }
 0x4b9   :  { %1617 = vmatmul.mubr.msk.bf16.gmra.mrb[36].mxu1 %vm2377_vm11, %v1616_v56 }
 0x4ba   :  { %1847 = vmatpush3.bf16.msra.mxu1 %v2574_v22 }
 0x4bb   :  { %1997 = vmatpush3.bf16.msra.mxu0 %v2569_v21  ;;  %1848 = vmatprep.subr.bf16.mxu1 %v2583_v23 }
 0x4bc   :  { %1998 = vmatprep.subr.bf16.mxu0 %v2588_v24 }
 0x4be   :  { %1849 = vmatpush3.bf16.msra.mxu1 %v2593_v25 }
 0x4bf   :  { %1999 = vmatpush3.bf16.msra.mxu0 %v2588_v24  ;;  %1850 = vmatprep.subr.bf16.mxu1 %v2602_v26 }
 0x4c0   :  { %2000 = vmatprep.subr.bf16.mxu0 %v2607_v27 }
 0x4c2   :  { %1851 = vmatpush3.bf16.msra.mxu1 %v2612_v28 }
 0x4c3   :  { %2001 = vmatpush3.bf16.msra.mxu0 %v2607_v27  ;;  %1852 = vmatprep.subr.bf16.mxu1 %v2621_v29 }
 0x4c4   :  { %2002 = vmatprep.subr.bf16.mxu0 %v2626_v34 }
 0x4c6   :  { %1853 = vmatpush3.bf16.msra.mxu1 %v2631_v36 }
 0x4c7   :  { %2003 = vmatpush3.bf16.msra.mxu0 %v2626_v34  ;;  %1854 = vmatprep.subr.bf16.mxu1 %v2640_v37 }
 0x4c8   :  { %2004 = vmatprep.subr.bf16.mxu0 %v2645_v39 }
 0x4ca   :  { %1855 = vmatpush3.bf16.msra.mxu1 %v2650_v42 }
 0x4cb   :  { %2005 = vmatpush3.bf16.msra.mxu0 %v2645_v39  ;;  %1856 = vmatprep.subr.bf16.mxu1 %v2659_v44 }
 0x4cc   :  { %2006 = vmatprep.subr.bf16.mxu0 %v2664_v45 }
 0x4ce   :  { %1857 = vmatpush3.bf16.msra.mxu1 %v2669_v48 }
 0x4cf   :  { %2007 = vmatpush3.bf16.msra.mxu0 %v2664_v45 }
 0x584   :  { %v1820_v7 = vpop.f32.mrb[32].mxu1  ;;  %v1990_v13 = vpop.f32.mrb[20].mxu0 }
 0x585   :  { %v1821_v17 = vpop.f32.mrb[33].mxu1  ;;  %v1302_v18 = vpop.f32.mrb[21].mxu0 }
 0x586   :  { %v1822_v19 = vadd.f32 %v1821_v17, %v1820_v7  ;;  %v1823_v20 = vpop.f32.mrb[34].mxu1  ;;  %v1991_v21 = vpop.f32.mrb[22].mxu0 }
 0x587   :  { %v1824_v22 = vpop.f32.mrb[35].mxu1  ;;  %v1305_v23 = vpop.f32.mrb[23].mxu0 }
 0x588   :  { %v1303_v24 = vadd.f32 %v1822_v19, %v1302_v18  ;;  %v1825_v25 = vadd.f32 %v1824_v22, %v1823_v20 }
 0x58a   :  { %v1317_v26 = vmul.f32 %v2764_v51, %v1303_v24  ;;  %v1306_v27 = vadd.f32 %v1825_v25, %v1305_v23 }
 0x58c   :  { %v1321_v28 = vadd.f32 %v2769_v5, %v1317_v26  ;;  %v1318_v29 = vmul.f32 %v2764_v51, %v1306_v27  ;;  %v1826_v34 = vpop.f32.mrb[36].mxu1 }
 0x58d   :  { %v1827_v36 = vpop.f32.mrb[37].mxu1 }
 0x58e   :  { %v1325_v37 = vmax.f32 %v1321_v28, 0.0  ;;  %v1322_v39 = vadd.f32 %v2769_v5, %v1318_v29  ;;  %v1828_v42 = vadd.f32 %v1827_v36, %v1826_v34  ;;  %v1829_v44 = vpop.f32.mrb[38].mxu1 }
 0x58f   :  { %v1830_v45 = vpop.f32.mrb[39].mxu1 }
 0x590   :  { %v1329_v48 = vadd.f32 %v1325_v37, %v2681_v33  ;;  %v1326_v16 = vmax.f32 %v1322_v39, 0.0  ;;  %v1311_v50 = vadd.f32 %v1990_v13, %v1828_v42  ;;  %v1831_v57 = vadd.f32 %v1830_v45, %v1829_v44 }
 0x592   :  { %v1330_v47 = vadd.f32 %v1326_v16, %v2683_v8  ;;  %v1319_v4 = vmul.f32 %v2764_v51, %v1311_v50  ;;  %v1333_v59 = vrot.slane %v1329_v48, 7  ;;  %v1345_v14 = vrot.slane %v1329_v48, 1 }
 0x593   :  { %v1314_v60 = vadd.f32 %v1991_v21, %v1831_v57 }
 0x594   :  { %v1334_v61 = vrot.slane %v1330_v47, 7  ;;  %v1346_v53 = vrot.slane %v1330_v47, 1  ;;  %v1323_v62 = vadd.f32 %v2769_v5, %v1319_v4  ;;  %v1358_v63 = vpack.c.bf16 %v1330_v47, %v1329_v48 }
 0x595   :  { %v1320_v1 = vmul.f32 %v2764_v51, %v1314_v60 }
 0x596   :  { %v1339_v33 = vsel %vm235_vm1, %v1333_v59, %v1334_v61  ;;  %v1327_v2 = vmax.f32 %v1323_v62, 0.0  ;;  %1395 = vmatprep.mubr.bf16.mxu1 %v1358_v63  ;;  %v1351_v8 = vsel %vm248_vm2, %v1345_v14, %v1346_v53 }
 0x597   :  { %v1324_v6 = vadd.f32 %v2769_v5, %v1320_v1 }
 0x598   :  { %v1331_v12 = vadd.f32 %v1327_v2, %v2690_v41 }
 0x599   :  { %v1328_v30 = vmax.f32 %v1324_v6, 0.0 }
 0x59a   :  { %v1347_v32 = vrot.slane %v1331_v12, 1  ;;  %v1335_v9 = vrot.slane %v1331_v12, 7 }
 0x59b   :  { %v1332_v10 = vadd.f32 %v1328_v30, %v2695_v49 }
 0x59c   :  { %v1350_v11 = vsel %vm248_vm2, %v1346_v53, %v1347_v32  ;;  %v1338_v15 = vsel %vm235_vm1, %v1334_v61, %v1335_v9 }
 0x59d   :  { %v1336_v52 = vrot.slane %v1332_v10, 7  ;;  %v1348_v54 = vrot.slane %v1332_v10, 1  ;;  %v1636_v55 = vpack.c.bf16 %v1350_v11, %v1351_v8  ;;  %v1361_v56 = vpack.c.bf16 %v1332_v10, %v1331_v12 }
 0x59f   :  { %v1340_v7 = vsel %vm235_vm1, %v1336_v52, %v1333_v59  ;;  %2008 = vmatprep.mubr.msk.bf16.mxu0 %vm2350_vm8, %v1636_v55  ;;  %v1349_v41 = vsel %vm248_vm2, %v1347_v32, %v1348_v54  ;;  %v1352_v49 = vsel %vm248_vm2, %v1348_v54, %v1345_v14  ;;  %v1337_v13 = vsel %vm235_vm1, %v1335_v9, %v1336_v52 }
 0x5a0   :  { %v1628_v17 = vpack.c.bf16 %v1339_v33, %v1340_v7  ;;  %v1640_v18 = vpack.c.bf16 %v1352_v49, %v1349_v41  ;;  %v1632_v19 = vpack.c.bf16 %v1337_v13, %v1338_v15 }
 0x5a2   :  { %1629 = vmatmul.mubr.msk.bf16.vlgmr.msra.gmra.mrb[40].mxu1 %vm2333_vm7, %v1628_v17  ;;  %2009 = vmatmul.mubr.msk.bf16.vlgmr.msra.gmra.mrb[24].mxu0 %vm2355_vm9, %v1640_v18 }
 0x5a3   :  { %1403 = vmatprep.mubr.bf16.mxu1 %v1361_v56 }
 0x5aa   :  { %1633 = vmatmul.mubr.msk.bf16.gmra.mrb[44].mxu1 %vm2377_vm11, %v1632_v19 }
 0x675   :  { %v1858_v0 = vpop.f32.mrb[40].mxu1  ;;  %v2010_v20 = vpop.f32.mrb[24].mxu0 }
 0x676   :  { %v1859_v21 = vpop.f32.mrb[41].mxu1  ;;  %v1446_v22 = vpop.f32.mrb[25].mxu0 }
 0x677   :  { %v1860_v23 = vadd.f32 %v1859_v21, %v1858_v0  ;;  %v1861_v31 = vpop.f32.mrb[42].mxu1  ;;  %v2011_v24 = vpop.f32.mrb[26].mxu0 }
 0x678   :  { %v1862_v25 = vpop.f32.mrb[43].mxu1  ;;  %v1449_v26 = vpop.f32.mrb[27].mxu0 }
 0x679   :  { %v1447_v27 = vadd.f32 %v1860_v23, %v1446_v22  ;;  %v1863_v28 = vadd.f32 %v1862_v25, %v1861_v31 }
 0x67b   :  { %v1461_v58 = vmul.f32 %v2764_v51, %v1447_v27  ;;  %v1450_v29 = vadd.f32 %v1863_v28, %v1449_v26 }
 0x67d   :  { %v1465_v3 = vadd.f32 %v2769_v5, %v1461_v58  ;;  %v1462_v34 = vmul.f32 %v2764_v51, %v1450_v29  ;;  %v1864_v35 = vpop.f32.mrb[44].mxu1 }
 0x67e   :  { %v1865_v36 = vpop.f32.mrb[45].mxu1 }
 0x67f   :  { %v1469_v37 = vmax.f32 %v1465_v3, 0.0  ;;  %v1466_v39 = vadd.f32 %v2769_v5, %v1462_v34  ;;  %v1866_v42 = vadd.f32 %v1865_v36, %v1864_v35  ;;  %v1867_v44 = vpop.f32.mrb[46].mxu1 }
 0x680   :  { %v1868_v45 = vpop.f32.mrb[47].mxu1 }
 0x681   :  { %v1473_v48 = vadd.f32 %v1469_v37, %v2302_v40  ;;  %v1470_v16 = vmax.f32 %v1466_v39, 0.0  ;;  %v1455_v50 = vadd.f32 %v2010_v20, %v1866_v42  ;;  %v1869_v57 = vadd.f32 %v1868_v45, %v1867_v44 }
 0x683   :  { %1477 = vst [vmem:[%s2906_s9] sm:$0xff] %v1473_v48  ;;  %v1474_v47 = vadd.f32 %v1470_v16, %v2312_v46  ;;  %v1463_v4 = vmul.f32 %v2764_v51, %v1455_v50  ;;  %v1458_v59 = vadd.f32 %v2011_v24, %v1869_v57 }
 0x685   :  { %1478 = vst [vmem:[%s2906_s9 + $0x8] sm:$0xff] %v1474_v47  ;;  %v1467_v14 = vadd.f32 %v2769_v5, %v1463_v4  ;;  %v1464_v40 = vmul.f32 %v2764_v51, %v1458_v59 }
 0x687   :  { %v1471_v60 = vmax.f32 %v1467_v14, 0.0  ;;  %v1468_v61 = vadd.f32 %v2769_v5, %v1464_v40 }
 0x689   :  { %v1475_v53 = vadd.f32 %v1471_v60, %v2300_v38  ;;  %v1472_v62 = vmax.f32 %v1468_v61, 0.0 }
 0x68b   :  { %1479 = vst [vmem:[%s2906_s9 + $0x10] sm:$0xff] %v1475_v53  ;;  %v1476_v46 = vadd.f32 %v1472_v62, %v2305_v43 }
 0x68d   :  { %1480 = vst [vmem:[%s2906_s9 + $0x18] sm:$0xff] %v1476_v46 }

</bundles_post_ra>
